<compile_context>
chip_gen: v7x
topology: tpu7x:2x2x1
jax: 0.10.0
libtpu: 0.0.40
codegen_flags: <defaults>
</compile_context>

<pallas_src>
import math

import jax
import jax.numpy as jnp
from jax import lax
from jax.experimental import pallas as pl
from jax.experimental.pallas import tpu as pltpu


def _round_up(x, m):
    return ((x + m - 1) // m) * m


# ---------------------------------------------------------------------------
# Pallas kernel: one (batch entry, coord tile) step of the FourierNet forward.
# ---------------------------------------------------------------------------
def _inr_kernel(x_ref, y2b_ref, wf_ref, w1_ref, wout_ref, bout_ref, out_ref):
    # x_ref    : (1, coord_dim, TN)                    coord tile (points on lanes)
    # y2b_ref  : (1, codes_per_b*n_filters*hidden, 1)  W2 @ code + b, all code rows
    # wf_ref   : (n_filters*hidden//2, coord_dim)      packed, pre-scaled Fourier weights
    # w1_ref   : (nlayers, hidden, hidden)             CodeBilinear weights1, (out, in)
    # wout_ref : (hidden, 1)                           output_linear weight
    # bout_ref : (1, 1) in SMEM                        output_linear bias
    # out_ref  : (1, codes_per_b, TN)                  lane-dense output rows
    nlayers, hidden, _ = w1_ref.shape
    n_filters = nlayers + 1
    h2 = hidden // 2
    codes_per_b = out_ref.shape[1]

    x = x_ref[0]                                               # (coord_dim, TN)
    # All Fourier projections fused into a single matmul: (n_filters*h2, TN),
    # computed ONCE per (batch, tile) and shared across all code rows.
    proj = jnp.dot(wf_ref[...], x, preferred_element_type=jnp.float32)
    sin_all = jnp.sin(proj)
    cos_all = jnp.cos(proj)
    # Per-layer Fourier filters (sublane-aligned slices + stack), built once.
    filts = [
        jnp.concatenate(
            [sin_all[l * h2:(l + 1) * h2, :], cos_all[l * h2:(l + 1) * h2, :]],
            axis=0)                                            # (hidden, TN)
        for l in range(n_filters)
    ]

    y2b = y2b_ref[0]                                           # (C*F*hidden, 1)
    wout = wout_ref[...]                                       # (hidden, 1)
    bout = bout_ref[0, 0]

    # Static loop over code rows (nsteps*state_dim); filters are reused, only
    # the (hidden, hidden) @ (hidden, TN) recurrence differs per code row.
    for c in range(codes_per_b):
        base = c * n_filters * hidden
        out = None
        for l in range(n_filters):
            g = y2b[base + l * hidden: base + (l + 1) * hidden, :]   # (hidden, 1)
            if l == 0:
                # Layer 0: previous activation is exactly x*0 -> the W1 term is zero.
                out = filts[0] * g
            else:
                y1 = jnp.dot(w1_ref[l - 1], out,
                             preferred_element_type=jnp.float32)     # (hidden, TN)
                out = filts[l] * (y1 + g)
        # output_linear (hidden -> 1), kept lane-dense as a (1, TN) row.
        z = jnp.sum(out * wout, axis=0, keepdims=True) + bout
        out_ref[0, c:c + 1, :] = z


# ---------------------------------------------------------------------------
# Wrapper: layout plumbing in plain JAX, hot path in the Pallas kernel.
# ---------------------------------------------------------------------------
def mydino_forward_pallas(coord, codes, params, tile_n=2048):
    coord = jnp.asarray(coord, jnp.float32)
    codes = jnp.asarray(codes, jnp.float32)

    coord_dim = coord.shape[-1]
    code_dim = codes.shape[-1]
    base = jnp.broadcast_shapes(coord.shape[:-1], codes.shape[:-1])
    bs, nsteps, state_dim = base[0], base[1], base[-1]
    domain = tuple(base[2:-1])
    hw = int(math.prod(domain)) if domain else 1

    # Module layout contract: coord expanded over nsteps/state_dim, codes over domain.
    assert coord.shape[1] == 1 and coord.shape[-2] == 1
    assert all(s == 1 for s in codes.shape[2:-2])

    wf = params["wf"]                     # (n_filters, hidden//2, coord_dim)
    w1 = params["w1"]                     # (nlayers, hidden, hidden)
    w2 = params["w2"]                     # (n_filters, hidden, code_dim)
    b = params["b"]                       # (n_filters, hidden)
    wout = params["wout"]                 # (1, hidden)
    bout = params["bout"]                 # (1,)
    weight_scale = params["weight_scale"]
    n_filters, h2, _ = wf.shape
    nlayers = n_filters - 1
    hidden = w1.shape[-1]
    assert nlayers >= 1

    # --- coord: (bs, coord_dim, HW_pad), points on the lane axis -------------
    tn = min(_round_up(int(tile_n), 128), _round_up(hw, 128))
    hw_pad = _round_up(hw, tn)
    coord_b = jnp.broadcast_to(coord.reshape(coord.shape[0], hw, coord_dim),
                               (bs, hw, coord_dim))
    coord_t = jnp.transpose(coord_b, (0, 2, 1))                # (bs, coord_dim, hw)
    coord_t = jnp.pad(coord_t, ((0, 0), (0, 0), (0, hw_pad - hw)))

    # --- codes: only bs*nsteps*state_dim unique rows; fold W2 and b here -----
    codes_per_b = nsteps * state_dim
    codes_b = jnp.broadcast_to(
        codes.reshape(codes.shape[0], nsteps, state_dim, code_dim),
        (bs, nsteps, state_dim, code_dim))
    y2b = jnp.einsum("bnsd,lfd->bnslf", codes_b, w2,
                     precision=lax.Precision.HIGHEST) + b
    y2b = y2b.reshape(bs, codes_per_b * n_filters * hidden, 1)

    # --- packed / transposed weights -----------------------------------------
    wf_packed = (wf * weight_scale).reshape(n_filters * h2, coord_dim)
    wout_col = wout.reshape(hidden, 1)
    bout_smem = bout.reshape(1, 1)

    n_j = hw_pad // tn
    grid = (bs, n_j)

    def _full(arr):
        nd = arr.ndim
        return pl.BlockSpec(arr.shape, lambda bi, j, _nd=nd: (0,) * _nd)

    z = pl.pallas_call(
        _inr_kernel,
        out_shape=jax.ShapeDtypeStruct((bs, codes_per_b, hw_pad), jnp.float32),
        grid_spec=pltpu.PrefetchScalarGridSpec(
            num_scalar_prefetch=0,
            grid=grid,
            in_specs=[
                # coord tile, shared by every code row of this batch entry
                pl.BlockSpec((1, coord_dim, tn), lambda bi, j: (bi, 0, j)),
                # fused (W2 @ code + b) columns for all code rows of this batch
                pl.BlockSpec((1, codes_per_b * n_filters * hidden, 1),
                             lambda bi, j: (bi, 0, 0)),
                _full(wf_packed),
                _full(w1),
                _full(wout_col),
                pl.BlockSpec(memory_space=pltpu.MemorySpace.SMEM),
            ],
            out_specs=pl.BlockSpec((1, codes_per_b, tn), lambda bi, j: (bi, 0, j)),
        ),
        compiler_params=pltpu.CompilerParams(
            dimension_semantics=("parallel", "parallel"),
            vmem_limit_bytes=48 * 1024 * 1024),
    )(coord_t, y2b, wf_packed, w1, wout_col, bout_smem)

    # (bs, codes_per_b, HW_pad) -> (bs, nsteps, *domain, state_dim)
    z = z[:, :, :hw].reshape((bs, nsteps, state_dim) + domain)
    perm = (0, 1) + tuple(range(3, 3 + len(domain))) + (2,)
    out = jnp.transpose(z, perm)
    return out, coord


# ---------------------------------------------------------------------------
# Pure-JAX reference (mirrors the PyTorch module exactly, incl. dead W1_0).
# ---------------------------------------------------------------------------
def mydino_forward_ref(coord, codes, params):
    hp = lax.Precision.HIGHEST
    wf = params["wf"] * params["weight_scale"]
    n_filters = wf.shape[0]
    x = coord
    out = x * 0.0
    for l in range(n_filters):
        proj = jnp.einsum("...i,oi->...o", x, wf[l], precision=hp)
        filt = jnp.concatenate([jnp.sin(proj), jnp.cos(proj)], axis=-1)
        w1 = params["w1_0"] if l == 0 else params["w1"][l - 1]
        y1 = jnp.einsum("...i,oi->...o", out, w1, precision=hp)
        y2 = jnp.einsum("...i,oi->...o", codes, params["w2"][l], precision=hp)
        out = filt * (y1 + y2 + params["b"][l])
    z = jnp.einsum("...i,oi->...o", out, params["wout"], precision=hp) + params["bout"]
    return z[..., 0], coord


# ---------------------------------------------------------------------------
# Deterministic parameter construction (PyTorch (out, in) weight layouts).
# ---------------------------------------------------------------------------
def make_params(key, coord_dim, code_dim, hidden_dim, nlayers, input_scale=64.0):
    n_filters = nlayers + 1
    h2 = hidden_dim // 2

    def uni(k, shape, fan_in):
        bound = 1.0 / math.sqrt(fan_in)
        return jax.random.uniform(k, shape, jnp.float32, -bound, bound)

    ks = jax.random.split(key, 8)
    return {
        "wf": uni(ks[0], (n_filters, h2, coord_dim), coord_dim),
        "w1_0": uni(ks[1], (hidden_dim, coord_dim), coord_dim),  # dead (x*0); ref only
        "w1": uni(ks[2], (nlayers, hidden_dim, hidden_dim), hidden_dim),
        "w2": uni(ks[3], (n_filters, hidden_dim, code_dim), code_dim),
        "b": uni(ks[4], (n_filters, hidden_dim), hidden_dim),
        "wout": uni(ks[5], (1, hidden_dim), hidden_dim),
        "bout": uni(ks[6], (1,), hidden_dim),
        "weight_scale": input_scale / math.sqrt(nlayers + 1),
    }


if __name__ == "__main__":
    key = jax.random.PRNGKey(0)

    # Small, module-consistent shapes.
    bs, nsteps, H, W, state_dim = 2, 2, 8, 8, 2
    coord_dim, code_dim, hidden_dim, nlayers = 2, 16, 32, 3

    k_par, k_coord, k_code = jax.random.split(key, 3)
    params = make_params(k_par, coord_dim, code_dim, hidden_dim, nlayers,
                         input_scale=64.0)

    # coord: (bs, nsteps(expanded)=1, H, W, state_dim(expanded)=1, coord_dim)
    coord = jax.random.uniform(k_coord, (bs, 1, H, W, 1, coord_dim),
                               jnp.float32, minval=-1.0, maxval=1.0)
    # codes: (bs, nsteps, H(expanded)=1, W(expanded)=1, state_dim, code_dim)
    codes = jax.random.normal(k_code, (bs, nsteps, 1, 1, state_dim, code_dim),
                              jnp.float32)

    out_k, x_k = mydino_forward_pallas(coord, codes, params, tile_n=2048)
    jax.block_until_ready(out_k)

    out_r, x_r = mydino_forward_ref(coord, codes, params)
    jax.block_until_ready(out_r)

    assert out_k.shape == (bs, nsteps, H, W, state_dim), out_k.shape
    max_err = float(jnp.max(jnp.abs(out_k - out_r)))
    assert jnp.allclose(out_k, out_r, rtol=1e-3, atol=1e-3), max_err
    assert jnp.array_equal(x_k, coord)

    print("KERNEL_OK")
</pallas_src>

<mosaic_0001>
module attributes {stable_mosaic.version = 11 : i64} {
  func.func @_inr_kernel(%arg0: i32, %arg1: i32, %arg2: memref<1x2x128xf32, #tpu.memory_space<vmem>>, %arg3: memref<1x512x1xf32, #tpu.memory_space<vmem>>, %arg4: memref<64x2xf32, #tpu.memory_space<vmem>>, %arg5: memref<3x32x32xf32, #tpu.memory_space<vmem>>, %arg6: memref<32x1xf32, #tpu.memory_space<vmem>>, %arg7: memref<1x1xf32, #tpu.memory_space<smem>>, %arg8: memref<1x4x128xf32, #tpu.memory_space<vmem>>) attributes {dimension_semantics = [#tpu.dimension_semantics<parallel>, #tpu.dimension_semantics<parallel>], iteration_bounds = array<i64: 2, 1>, scalar_prefetch = 0 : i64, scratch_operands = 0 : i64, tpu.core_type = #tpu.core_type<tc>, window_params = [{transform_indices = @transform_0, window_bounds = array<i64: 1, 2, 128>}, {transform_indices = @transform_1, window_bounds = array<i64: 1, 512, 1>}, {pipeline_mode = #tpu.pipeline_mode<synchronous>, transform_indices = @transform_2, window_bounds = array<i64: 64, 2>}, {pipeline_mode = #tpu.pipeline_mode<synchronous>, transform_indices = @transform_3, window_bounds = array<i64: 3, 32, 32>}, {pipeline_mode = #tpu.pipeline_mode<synchronous>, transform_indices = @transform_4, window_bounds = array<i64: 32, 1>}, {transform_indices = @transform_5, window_bounds = array<i64: 1, 1>}, {transform_indices = @transform_6, window_bounds = array<i64: 1, 4, 128>}]} {
    %c0 = arith.constant 0 : index
    %c0_0 = arith.constant 0 : index
    %c0_1 = arith.constant 0 : index
    %0 = vector.load %arg2[%c0, %c0_0, %c0_1] : memref<1x2x128xf32, #tpu.memory_space<vmem>>, vector<1x2x128xf32>
    %1 = vector.shape_cast %0 : vector<1x2x128xf32> to vector<2x128xf32>
    %c0_2 = arith.constant 0 : index
    %c0_3 = arith.constant 0 : index
    %2 = vector.load %arg4[%c0_2, %c0_3] : memref<64x2xf32, #tpu.memory_space<vmem>>, vector<64x2xf32>
    %cst = arith.constant dense<0.000000e+00> : vector<64x128xf32>
    %3 = tpu.matmul %2, %1, %cst {dimension_numbers = #tpu.dot_dimension_numbers<[1], [0], [0], [1], [0, 0, 1, 1], [], []>} : vector<64x2xf32>, vector<2x128xf32>, vector<64x128xf32> -> vector<64x128xf32>
    %4 = math.sin %3 : vector<64x128xf32>
    %5 = math.cos %3 : vector<64x128xf32>
    %6 = vector.extract_strided_slice %4 {offsets = [0, 0], sizes = [16, 128], strides = [1, 1]} : vector<64x128xf32> to vector<16x128xf32>
    %7 = vector.extract_strided_slice %5 {offsets = [0, 0], sizes = [16, 128], strides = [1, 1]} : vector<64x128xf32> to vector<16x128xf32>
    %8 = tpu.concatenate %6, %7 in 0 : vector<16x128xf32>, vector<16x128xf32> -> vector<32x128xf32>
    %9 = vector.extract_strided_slice %4 {offsets = [16, 0], sizes = [16, 128], strides = [1, 1]} : vector<64x128xf32> to vector<16x128xf32>
    %10 = vector.extract_strided_slice %5 {offsets = [16, 0], sizes = [16, 128], strides = [1, 1]} : vector<64x128xf32> to vector<16x128xf32>
    %11 = tpu.concatenate %9, %10 in 0 : vector<16x128xf32>, vector<16x128xf32> -> vector<32x128xf32>
    %12 = vector.extract_strided_slice %4 {offsets = [32, 0], sizes = [16, 128], strides = [1, 1]} : vector<64x128xf32> to vector<16x128xf32>
    %13 = vector.extract_strided_slice %5 {offsets = [32, 0], sizes = [16, 128], strides = [1, 1]} : vector<64x128xf32> to vector<16x128xf32>
    %14 = tpu.concatenate %12, %13 in 0 : vector<16x128xf32>, vector<16x128xf32> -> vector<32x128xf32>
    %15 = vector.extract_strided_slice %4 {offsets = [48, 0], sizes = [16, 128], strides = [1, 1]} : vector<64x128xf32> to vector<16x128xf32>
    %16 = vector.extract_strided_slice %5 {offsets = [48, 0], sizes = [16, 128], strides = [1, 1]} : vector<64x128xf32> to vector<16x128xf32>
    %17 = tpu.concatenate %15, %16 in 0 : vector<16x128xf32>, vector<16x128xf32> -> vector<32x128xf32>
    %c0_4 = arith.constant 0 : index
    %c0_5 = arith.constant 0 : index
    %c0_6 = arith.constant 0 : index
    %18 = vector.load %arg3[%c0_4, %c0_5, %c0_6] : memref<1x512x1xf32, #tpu.memory_space<vmem>>, vector<1x512x1xf32>
    %19 = vector.shape_cast %18 : vector<1x512x1xf32> to vector<512x1xf32>
    %c0_7 = arith.constant 0 : index
    %c0_8 = arith.constant 0 : index
    %20 = vector.load %arg6[%c0_7, %c0_8] : memref<32x1xf32, #tpu.memory_space<vmem>>, vector<32x1xf32>
    %c0_9 = arith.constant 0 : index
    %c0_10 = arith.constant 0 : index
    %21 = memref.load %arg7[%c0_9, %c0_10] : memref<1x1xf32, #tpu.memory_space<smem>>
    %22 = vector.extract_strided_slice %19 {offsets = [0, 0], sizes = [32, 1], strides = [1, 1]} : vector<512x1xf32> to vector<32x1xf32>
    %23 = vector.broadcast %22 : vector<32x1xf32> to vector<32x128xf32>
    %24 = arith.mulf %8, %23 : vector<32x128xf32>
    %25 = vector.extract_strided_slice %19 {offsets = [32, 0], sizes = [32, 1], strides = [1, 1]} : vector<512x1xf32> to vector<32x1xf32>
    %c0_11 = arith.constant 0 : index
    %c0_12 = arith.constant 0 : index
    %c0_13 = arith.constant 0 : index
    %26 = vector.load %arg5[%c0_11, %c0_12, %c0_13] : memref<3x32x32xf32, #tpu.memory_space<vmem>>, vector<1x32x32xf32>
    %27 = vector.shape_cast %26 : vector<1x32x32xf32> to vector<32x32xf32>
    %cst_14 = arith.constant dense<0.000000e+00> : vector<32x128xf32>
    %28 = tpu.matmul %27, %24, %cst_14 {dimension_numbers = #tpu.dot_dimension_numbers<[1], [0], [0], [1], [0, 0, 1, 1], [], []>} : vector<32x32xf32>, vector<32x128xf32>, vector<32x128xf32> -> vector<32x128xf32>
    %29 = vector.broadcast %25 : vector<32x1xf32> to vector<32x128xf32>
    %30 = arith.addf %28, %29 : vector<32x128xf32>
    %31 = arith.mulf %11, %30 : vector<32x128xf32>
    %32 = vector.extract_strided_slice %19 {offsets = [64, 0], sizes = [32, 1], strides = [1, 1]} : vector<512x1xf32> to vector<32x1xf32>
    %c1 = arith.constant 1 : index
    %c0_15 = arith.constant 0 : index
    %c0_16 = arith.constant 0 : index
    %33 = vector.load %arg5[%c1, %c0_15, %c0_16] : memref<3x32x32xf32, #tpu.memory_space<vmem>>, vector<1x32x32xf32>
    %34 = vector.shape_cast %33 : vector<1x32x32xf32> to vector<32x32xf32>
    %cst_17 = arith.constant dense<0.000000e+00> : vector<32x128xf32>
    %35 = tpu.matmul %34, %31, %cst_17 {dimension_numbers = #tpu.dot_dimension_numbers<[1], [0], [0], [1], [0, 0, 1, 1], [], []>} : vector<32x32xf32>, vector<32x128xf32>, vector<32x128xf32> -> vector<32x128xf32>
    %36 = vector.broadcast %32 : vector<32x1xf32> to vector<32x128xf32>
    %37 = arith.addf %35, %36 : vector<32x128xf32>
    %38 = arith.mulf %14, %37 : vector<32x128xf32>
    %39 = vector.extract_strided_slice %19 {offsets = [96, 0], sizes = [32, 1], strides = [1, 1]} : vector<512x1xf32> to vector<32x1xf32>
    %c2 = arith.constant 2 : index
    %c0_18 = arith.constant 0 : index
    %c0_19 = arith.constant 0 : index
    %40 = vector.load %arg5[%c2, %c0_18, %c0_19] : memref<3x32x32xf32, #tpu.memory_space<vmem>>, vector<1x32x32xf32>
    %41 = vector.shape_cast %40 : vector<1x32x32xf32> to vector<32x32xf32>
    %cst_20 = arith.constant dense<0.000000e+00> : vector<32x128xf32>
    %42 = tpu.matmul %41, %38, %cst_20 {dimension_numbers = #tpu.dot_dimension_numbers<[1], [0], [0], [1], [0, 0, 1, 1], [], []>} : vector<32x32xf32>, vector<32x128xf32>, vector<32x128xf32> -> vector<32x128xf32>
    %43 = vector.broadcast %39 : vector<32x1xf32> to vector<32x128xf32>
    %44 = arith.addf %42, %43 : vector<32x128xf32>
    %45 = arith.mulf %17, %44 : vector<32x128xf32>
    %46 = vector.broadcast %20 : vector<32x1xf32> to vector<32x128xf32>
    %47 = arith.mulf %45, %46 : vector<32x128xf32>
    %cst_21 = arith.constant dense<0.000000e+00> : vector<128xf32>
    %48 = vector.multi_reduction <add>, %47, %cst_21 [0] : vector<32x128xf32> to vector<128xf32>
    %49 = vector.shape_cast %48 : vector<128xf32> to vector<1x128xf32>
    %50 = vector.broadcast %21 : f32 to vector<1x128xf32>
    %51 = arith.addf %49, %50 : vector<1x128xf32>
    %c0_22 = arith.constant 0 : index
    %c0_23 = arith.constant 0 : index
    %c0_24 = arith.constant 0 : index
    %52 = vector.load %arg8[%c0_22, %c0_23, %c0_24] : memref<1x4x128xf32, #tpu.memory_space<vmem>>, vector<1x1x128xf32>
    %53 = vector.shape_cast %52 : vector<1x1x128xf32> to vector<1x128xf32>
    %54 = vector.shape_cast %51 : vector<1x128xf32> to vector<1x1x128xf32>
    tpu.vector_store %arg8[%c0_22, %c0_23, %c0_24], %54 {strides = array<i32>} : memref<1x4x128xf32, #tpu.memory_space<vmem>>, vector<1x1x128xf32>,
    %55 = vector.extract_strided_slice %19 {offsets = [128, 0], sizes = [32, 1], strides = [1, 1]} : vector<512x1xf32> to vector<32x1xf32>
    %56 = vector.broadcast %55 : vector<32x1xf32> to vector<32x128xf32>
    %57 = arith.mulf %8, %56 : vector<32x128xf32>
    %58 = vector.extract_strided_slice %19 {offsets = [160, 0], sizes = [32, 1], strides = [1, 1]} : vector<512x1xf32> to vector<32x1xf32>
    %c0_25 = arith.constant 0 : index
    %c0_26 = arith.constant 0 : index
    %c0_27 = arith.constant 0 : index
    %59 = vector.load %arg5[%c0_25, %c0_26, %c0_27] : memref<3x32x32xf32, #tpu.memory_space<vmem>>, vector<1x32x32xf32>
    %60 = vector.shape_cast %59 : vector<1x32x32xf32> to vector<32x32xf32>
    %cst_28 = arith.constant dense<0.000000e+00> : vector<32x128xf32>
    %61 = tpu.matmul %60, %57, %cst_28 {dimension_numbers = #tpu.dot_dimension_numbers<[1], [0], [0], [1], [0, 0, 1, 1], [], []>} : vector<32x32xf32>, vector<32x128xf32>, vector<32x128xf32> -> vector<32x128xf32>
    %62 = vector.broadcast %58 : vector<32x1xf32> to vector<32x128xf32>
    %63 = arith.addf %61, %62 : vector<32x128xf32>
    %64 = arith.mulf %11, %63 : vector<32x128xf32>
    %65 = vector.extract_strided_slice %19 {offsets = [192, 0], sizes = [32, 1], strides = [1, 1]} : vector<512x1xf32> to vector<32x1xf32>
    %c1_29 = arith.constant 1 : index
    %c0_30 = arith.constant 0 : index
    %c0_31 = arith.constant 0 : index
    %66 = vector.load %arg5[%c1_29, %c0_30, %c0_31] : memref<3x32x32xf32, #tpu.memory_space<vmem>>, vector<1x32x32xf32>
    %67 = vector.shape_cast %66 : vector<1x32x32xf32> to vector<32x32xf32>
    %cst_32 = arith.constant dense<0.000000e+00> : vector<32x128xf32>
    %68 = tpu.matmul %67, %64, %cst_32 {dimension_numbers = #tpu.dot_dimension_numbers<[1], [0], [0], [1], [0, 0, 1, 1], [], []>} : vector<32x32xf32>, vector<32x128xf32>, vector<32x128xf32> -> vector<32x128xf32>
    %69 = vector.broadcast %65 : vector<32x1xf32> to vector<32x128xf32>
    %70 = arith.addf %68, %69 : vector<32x128xf32>
    %71 = arith.mulf %14, %70 : vector<32x128xf32>
    %72 = vector.extract_strided_slice %19 {offsets = [224, 0], sizes = [32, 1], strides = [1, 1]} : vector<512x1xf32> to vector<32x1xf32>
    %c2_33 = arith.constant 2 : index
    %c0_34 = arith.constant 0 : index
    %c0_35 = arith.constant 0 : index
    %73 = vector.load %arg5[%c2_33, %c0_34, %c0_35] : memref<3x32x32xf32, #tpu.memory_space<vmem>>, vector<1x32x32xf32>
    %74 = vector.shape_cast %73 : vector<1x32x32xf32> to vector<32x32xf32>
    %cst_36 = arith.constant dense<0.000000e+00> : vector<32x128xf32>
    %75 = tpu.matmul %74, %71, %cst_36 {dimension_numbers = #tpu.dot_dimension_numbers<[1], [0], [0], [1], [0, 0, 1, 1], [], []>} : vector<32x32xf32>, vector<32x128xf32>, vector<32x128xf32> -> vector<32x128xf32>
    %76 = vector.broadcast %72 : vector<32x1xf32> to vector<32x128xf32>
    %77 = arith.addf %75, %76 : vector<32x128xf32>
    %78 = arith.mulf %17, %77 : vector<32x128xf32>
    %79 = vector.broadcast %20 : vector<32x1xf32> to vector<32x128xf32>
    %80 = arith.mulf %78, %79 : vector<32x128xf32>
    %cst_37 = arith.constant dense<0.000000e+00> : vector<128xf32>
    %81 = vector.multi_reduction <add>, %80, %cst_37 [0] : vector<32x128xf32> to vector<128xf32>
    %82 = vector.shape_cast %81 : vector<128xf32> to vector<1x128xf32>
    %83 = vector.broadcast %21 : f32 to vector<1x128xf32>
    %84 = arith.addf %82, %83 : vector<1x128xf32>
    %c0_38 = arith.constant 0 : index
    %c1_39 = arith.constant 1 : index
    %c0_40 = arith.constant 0 : index
    %85 = vector.load %arg8[%c0_38, %c1_39, %c0_40] : memref<1x4x128xf32, #tpu.memory_space<vmem>>, vector<1x1x128xf32>
    %86 = vector.shape_cast %85 : vector<1x1x128xf32> to vector<1x128xf32>
    %87 = vector.shape_cast %84 : vector<1x128xf32> to vector<1x1x128xf32>
    tpu.vector_store %arg8[%c0_38, %c1_39, %c0_40], %87 {strides = array<i32>} : memref<1x4x128xf32, #tpu.memory_space<vmem>>, vector<1x1x128xf32>,
    %88 = vector.extract_strided_slice %19 {offsets = [256, 0], sizes = [32, 1], strides = [1, 1]} : vector<512x1xf32> to vector<32x1xf32>
    %89 = vector.broadcast %88 : vector<32x1xf32> to vector<32x128xf32>
    %90 = arith.mulf %8, %89 : vector<32x128xf32>
    %91 = vector.extract_strided_slice %19 {offsets = [288, 0], sizes = [32, 1], strides = [1, 1]} : vector<512x1xf32> to vector<32x1xf32>
    %c0_41 = arith.constant 0 : index
    %c0_42 = arith.constant 0 : index
    %c0_43 = arith.constant 0 : index
    %92 = vector.load %arg5[%c0_41, %c0_42, %c0_43] : memref<3x32x32xf32, #tpu.memory_space<vmem>>, vector<1x32x32xf32>
    %93 = vector.shape_cast %92 : vector<1x32x32xf32> to vector<32x32xf32>
    %cst_44 = arith.constant dense<0.000000e+00> : vector<32x128xf32>
    %94 = tpu.matmul %93, %90, %cst_44 {dimension_numbers = #tpu.dot_dimension_numbers<[1], [0], [0], [1], [0, 0, 1, 1], [], []>} : vector<32x32xf32>, vector<32x128xf32>, vector<32x128xf32> -> vector<32x128xf32>
    %95 = vector.broadcast %91 : vector<32x1xf32> to vector<32x128xf32>
    %96 = arith.addf %94, %95 : vector<32x128xf32>
    %97 = arith.mulf %11, %96 : vector<32x128xf32>
    %98 = vector.extract_strided_slice %19 {offsets = [320, 0], sizes = [32, 1], strides = [1, 1]} : vector<512x1xf32> to vector<32x1xf32>
    %c1_45 = arith.constant 1 : index
    %c0_46 = arith.constant 0 : index
    %c0_47 = arith.constant 0 : index
    %99 = vector.load %arg5[%c1_45, %c0_46, %c0_47] : memref<3x32x32xf32, #tpu.memory_space<vmem>>, vector<1x32x32xf32>
    %100 = vector.shape_cast %99 : vector<1x32x32xf32> to vector<32x32xf32>
    %cst_48 = arith.constant dense<0.000000e+00> : vector<32x128xf32>
    %101 = tpu.matmul %100, %97, %cst_48 {dimension_numbers = #tpu.dot_dimension_numbers<[1], [0], [0], [1], [0, 0, 1, 1], [], []>} : vector<32x32xf32>, vector<32x128xf32>, vector<32x128xf32> -> vector<32x128xf32>
    %102 = vector.broadcast %98 : vector<32x1xf32> to vector<32x128xf32>
    %103 = arith.addf %101, %102 : vector<32x128xf32>
    %104 = arith.mulf %14, %103 : vector<32x128xf32>
    %105 = vector.extract_strided_slice %19 {offsets = [352, 0], sizes = [32, 1], strides = [1, 1]} : vector<512x1xf32> to vector<32x1xf32>
    %c2_49 = arith.constant 2 : index
    %c0_50 = arith.constant 0 : index
    %c0_51 = arith.constant 0 : index
    %106 = vector.load %arg5[%c2_49, %c0_50, %c0_51] : memref<3x32x32xf32, #tpu.memory_space<vmem>>, vector<1x32x32xf32>
    %107 = vector.shape_cast %106 : vector<1x32x32xf32> to vector<32x32xf32>
    %cst_52 = arith.constant dense<0.000000e+00> : vector<32x128xf32>
    %108 = tpu.matmul %107, %104, %cst_52 {dimension_numbers = #tpu.dot_dimension_numbers<[1], [0], [0], [1], [0, 0, 1, 1], [], []>} : vector<32x32xf32>, vector<32x128xf32>, vector<32x128xf32> -> vector<32x128xf32>
    %109 = vector.broadcast %105 : vector<32x1xf32> to vector<32x128xf32>
    %110 = arith.addf %108, %109 : vector<32x128xf32>
    %111 = arith.mulf %17, %110 : vector<32x128xf32>
    %112 = vector.broadcast %20 : vector<32x1xf32> to vector<32x128xf32>
    %113 = arith.mulf %111, %112 : vector<32x128xf32>
    %cst_53 = arith.constant dense<0.000000e+00> : vector<128xf32>
    %114 = vector.multi_reduction <add>, %113, %cst_53 [0] : vector<32x128xf32> to vector<128xf32>
    %115 = vector.shape_cast %114 : vector<128xf32> to vector<1x128xf32>
    %116 = vector.broadcast %21 : f32 to vector<1x128xf32>
    %117 = arith.addf %115, %116 : vector<1x128xf32>
    %c0_54 = arith.constant 0 : index
    %c2_55 = arith.constant 2 : index
    %c0_56 = arith.constant 0 : index
    %118 = vector.load %arg8[%c0_54, %c2_55, %c0_56] : memref<1x4x128xf32, #tpu.memory_space<vmem>>, vector<1x1x128xf32>
    %119 = vector.shape_cast %118 : vector<1x1x128xf32> to vector<1x128xf32>
    %120 = vector.shape_cast %117 : vector<1x128xf32> to vector<1x1x128xf32>
    tpu.vector_store %arg8[%c0_54, %c2_55, %c0_56], %120 {strides = array<i32>} : memref<1x4x128xf32, #tpu.memory_space<vmem>>, vector<1x1x128xf32>,
    %121 = vector.extract_strided_slice %19 {offsets = [384, 0], sizes = [32, 1], strides = [1, 1]} : vector<512x1xf32> to vector<32x1xf32>
    %122 = vector.broadcast %121 : vector<32x1xf32> to vector<32x128xf32>
    %123 = arith.mulf %8, %122 : vector<32x128xf32>
    %124 = vector.extract_strided_slice %19 {offsets = [416, 0], sizes = [32, 1], strides = [1, 1]} : vector<512x1xf32> to vector<32x1xf32>
    %c0_57 = arith.constant 0 : index
    %c0_58 = arith.constant 0 : index
    %c0_59 = arith.constant 0 : index
    %125 = vector.load %arg5[%c0_57, %c0_58, %c0_59] : memref<3x32x32xf32, #tpu.memory_space<vmem>>, vector<1x32x32xf32>
    %126 = vector.shape_cast %125 : vector<1x32x32xf32> to vector<32x32xf32>
    %cst_60 = arith.constant dense<0.000000e+00> : vector<32x128xf32>
    %127 = tpu.matmul %126, %123, %cst_60 {dimension_numbers = #tpu.dot_dimension_numbers<[1], [0], [0], [1], [0, 0, 1, 1], [], []>} : vector<32x32xf32>, vector<32x128xf32>, vector<32x128xf32> -> vector<32x128xf32>
    %128 = vector.broadcast %124 : vector<32x1xf32> to vector<32x128xf32>
    %129 = arith.addf %127, %128 : vector<32x128xf32>
    %130 = arith.mulf %11, %129 : vector<32x128xf32>
    %131 = vector.extract_strided_slice %19 {offsets = [448, 0], sizes = [32, 1], strides = [1, 1]} : vector<512x1xf32> to vector<32x1xf32>
    %c1_61 = arith.constant 1 : index
    %c0_62 = arith.constant 0 : index
    %c0_63 = arith.constant 0 : index
    %132 = vector.load %arg5[%c1_61, %c0_62, %c0_63] : memref<3x32x32xf32, #tpu.memory_space<vmem>>, vector<1x32x32xf32>
    %133 = vector.shape_cast %132 : vector<1x32x32xf32> to vector<32x32xf32>
    %cst_64 = arith.constant dense<0.000000e+00> : vector<32x128xf32>
    %134 = tpu.matmul %133, %130, %cst_64 {dimension_numbers = #tpu.dot_dimension_numbers<[1], [0], [0], [1], [0, 0, 1, 1], [], []>} : vector<32x32xf32>, vector<32x128xf32>, vector<32x128xf32> -> vector<32x128xf32>
    %135 = vector.broadcast %131 : vector<32x1xf32> to vector<32x128xf32>
    %136 = arith.addf %134, %135 : vector<32x128xf32>
    %137 = arith.mulf %14, %136 : vector<32x128xf32>
    %138 = vector.extract_strided_slice %19 {offsets = [480, 0], sizes = [32, 1], strides = [1, 1]} : vector<512x1xf32> to vector<32x1xf32>
    %c2_65 = arith.constant 2 : index
    %c0_66 = arith.constant 0 : index
    %c0_67 = arith.constant 0 : index
    %139 = vector.load %arg5[%c2_65, %c0_66, %c0_67] : memref<3x32x32xf32, #tpu.memory_space<vmem>>, vector<1x32x32xf32>
    %140 = vector.shape_cast %139 : vector<1x32x32xf32> to vector<32x32xf32>
    %cst_68 = arith.constant dense<0.000000e+00> : vector<32x128xf32>
    %141 = tpu.matmul %140, %137, %cst_68 {dimension_numbers = #tpu.dot_dimension_numbers<[1], [0], [0], [1], [0, 0, 1, 1], [], []>} : vector<32x32xf32>, vector<32x128xf32>, vector<32x128xf32> -> vector<32x128xf32>
    %142 = vector.broadcast %138 : vector<32x1xf32> to vector<32x128xf32>
    %143 = arith.addf %141, %142 : vector<32x128xf32>
    %144 = arith.mulf %17, %143 : vector<32x128xf32>
    %145 = vector.broadcast %20 : vector<32x1xf32> to vector<32x128xf32>
    %146 = arith.mulf %144, %145 : vector<32x128xf32>
    %cst_69 = arith.constant dense<0.000000e+00> : vector<128xf32>
    %147 = vector.multi_reduction <add>, %146, %cst_69 [0] : vector<32x128xf32> to vector<128xf32>
    %148 = vector.shape_cast %147 : vector<128xf32> to vector<1x128xf32>
    %149 = vector.broadcast %21 : f32 to vector<1x128xf32>
    %150 = arith.addf %148, %149 : vector<1x128xf32>
    %c0_70 = arith.constant 0 : index
    %c3 = arith.constant 3 : index
    %c0_71 = arith.constant 0 : index
    %151 = vector.load %arg8[%c0_70, %c3, %c0_71] : memref<1x4x128xf32, #tpu.memory_space<vmem>>, vector<1x1x128xf32>
    %152 = vector.shape_cast %151 : vector<1x1x128xf32> to vector<1x128xf32>
    %153 = vector.shape_cast %150 : vector<1x128xf32> to vector<1x1x128xf32>
    tpu.vector_store %arg8[%c0_70, %c3, %c0_71], %153 {strides = array<i32>} : memref<1x4x128xf32, #tpu.memory_space<vmem>>, vector<1x1x128xf32>,
    return
  }
  func.func @transform_0(%arg0: i32, %arg1: i32) -> (i32, i32, i32) {
    %c0_i32 = arith.constant 0 : i32
    %c0_i32_0 = arith.constant 0 : i32
    return %arg0, %c0_i32, %arg1 : i32, i32, i32
  }
  func.func @transform_1(%arg0: i32, %arg1: i32) -> (i32, i32, i32) {
    %c0_i32 = arith.constant 0 : i32
    %c0_i32_0 = arith.constant 0 : i32
    %c0_i32_1 = arith.constant 0 : i32
    return %arg0, %c0_i32, %c0_i32_0 : i32, i32, i32
  }
  func.func @transform_2(%arg0: i32, %arg1: i32) -> (i32, i32) {
    %c0_i32 = arith.constant 0 : i32
    %c0_i32_0 = arith.constant 0 : i32
    %c0_i32_1 = arith.constant 0 : i32
    return %c0_i32, %c0_i32_0 : i32, i32
  }
  func.func @transform_3(%arg0: i32, %arg1: i32) -> (i32, i32, i32) {
    %c0_i32 = arith.constant 0 : i32
    %c0_i32_0 = arith.constant 0 : i32
    %c0_i32_1 = arith.constant 0 : i32
    %c0_i32_2 = arith.constant 0 : i32
    return %c0_i32, %c0_i32_0, %c0_i32_1 : i32, i32, i32
  }
  func.func @transform_4(%arg0: i32, %arg1: i32) -> (i32, i32) {
    %c0_i32 = arith.constant 0 : i32
    %c0_i32_0 = arith.constant 0 : i32
    %c0_i32_1 = arith.constant 0 : i32
    return %c0_i32, %c0_i32_0 : i32, i32
  }
  func.func @transform_5(%arg0: i32, %arg1: i32) -> (i32, i32) {
    %c0_i32 = arith.constant 0 : i32
    %c0_i32_0 = arith.constant 0 : i32
    %c0_i32_1 = arith.constant 0 : i32
    return %c0_i32, %c0_i32_0 : i32, i32
  }
  func.func @transform_6(%arg0: i32, %arg1: i32) -> (i32, i32, i32) {
    %c0_i32 = arith.constant 0 : i32
    %c0_i32_0 = arith.constant 0 : i32
    return %arg0, %c0_i32, %arg1 : i32, i32, i32
  }
}

</mosaic_0001>

<bundles_post_ra>
// kernel: tpu_custom_call.1
= control target key start
LH: loop header
LB: loop body
LE: loop exit
PB: predicated region body
PF: predicated region fallthrough
CT: control target
= control target key end

     0   :  { %s6068_s0 = inlined_call_operand.vmem [shape: f32[2,2,128], index: 0, kind: input, shape index: {}]   ;;  %s6069_s1 = inlined_call_operand.vmem [shape: f32[2,512,1], index: 1, kind: input, shape index: {}]   ;;  %s6070_s2 = inlined_call_operand.vmem [shape: f32[64,2], index: 2, kind: input, shape index: {}]   ;;  %s6071_s3 = inlined_call_operand.vmem [shape: f32[3,32,32], index: 3, kind: input, shape index: {}]   ;;  %s6072_s4 = inlined_call_operand.vmem [shape: f32[32,1], index: 4, kind: input, shape index: {}]   ;;  %s6073_s5 = inlined_call_operand.<no memory space> [shape: f32[1,1], index: 5, kind: input, shape index: {}]   ;;  %s6074_s6 = inlined_call_operand.hbm [shape: f32[2,4,128], index: 6, kind: output, shape index: {}]  }
   0x1   :  { %11 = sst [smem:[#allocation2]] %s6073_s5 }
   0x2   :  { %12 = vsyncpa [#allocation4], 0 }
   0x3   :  { %14 = vsyncpa [#allocation4 + $0x1], 0  ;;  %s4749_s23 = smov 0   ;;  %s4751_s24 = smov 0  }
   0x4   :  { %s4753_s25 = smov 0   ;;  %s4755_s26 = smov 0  }
   0x5   :  { %s4757_s27 = smov 0   ;;  %s4759_s28 = smov 0  }
   0x6 LB: > { %s3939_s5 = sadd.s32 4294967295, %s4701_s28   ;;  %s3940_s29 = sadd.s32 4294967294, %s4701_s28   ;;  %s4701_s28 = sphi %s4759_s28, %s20_s28   ;;  %s4697_s27 = sphi %s4757_s27, %s6145_s27   ;;  %s4693_s26 = sphi %s4755_s26, %s6144_s26   ;;  %s4689_s25 = sphi %s4753_s25, %s6143_s25   ;;  %s4685_s24 = sphi %s4751_s24, %s6142_s24   ;;  %s4681_s23 = sphi %s4749_s23, %s6141_s23  }
   0x7   : > { %s32_s30 = sadd.s32 1, %s4697_s27  ;;  %s179_s7 = sadd.s32 1, %s4689_s25 }
   0x8   : > { %p34_p0 = scmp.ge.s32.totalorder %s32_s30, 2  ;;  %p189_p1 = scmp.ne.s32.totalorder %s4689_s25, %s4685_s24 }
   0x9   : > { %p190_p2 = scmp.eq.s32.totalorder %s3939_s5, 1  ;;  %p195_p3 = scmp.ne.s32.totalorder %s4685_s24, %s4681_s23 }
   0xa   : > { %s6147_s30 = smov (%p34_p0, %s32_s30), 0  ;;  %p196_p5 = scmp.eq.s32.totalorder %s3940_s29, 1 }
   0xb   : > { %p4789_p4 = por %p190_p2, %p189_p1  ;;  %s174_s9 = ssub.s32 %s4697_s27, %s6147_s30 }
   0xc   : > { %p3943_p6 = scmp.ge.s32.totalorder %s4701_s28, 1  ;;  %p177_p7 = scmp.eq.s32.totalorder %s174_s9, 0 }
   0xd   : > { %p4796_p8 = por %p196_p5, %p195_p3  ;;  %p244_p9 = scmp.lt.s32.totalorder %s4701_s28, 3 }
   0xe   : > { %s4802_s11 = scalar_select %p177_p7, %s4689_s25, %s179_s7  }
   0xf   : > { %p245_p10 = pnand %p3943_p6, %p244_p9 }
  0x11   : > { %248 = sbr.rel (%p245_p10) target bundleno = 1758 (0x6de), region = 44 }
  0x18   : > { %p281_p11 = scmp.lt.s32.totalorder %s4693_s26, 1  ;;  %v294_v0 = vld [vmem:[%s6070_s2] sm:$0xff]  ;;  %vm302_vm0 = vcmask 15360   ;;  %v4703_v1 = vmov 0   ;;  %vm327_vm1 = vcmask 1041408   ;;  %v295_v2 = vld [vmem:[%s6070_s2 + $0x8] sm:$0xff] }
  0x19   : > { %4213 = vmatprep.mubr.msk.f32.mxu0 %vm302_vm0, %v294_v0  ;;  %4587 = vset.pattern.permute.xlu0 %v4703_v1  ;;  %v296_v6 = vld [vmem:[%s6070_s2 + $0x10] sm:$0xff]  ;;  %v297_v9 = vld [vmem:[%s6070_s2 + $0x18] sm:$0xff]  ;;  %vm2209_vm2 = vcmask 261120   ;;  %s278_s20 = sand.u32 1, %s4685_s24   ;;  %s4102_s18 = sshll.u32 %s4693_s26, 6 }
  0x1a   : > { %s282_s14 = scalar_select %p281_p11, %s4693_s26, 1  ;;  %4588 = vset.pattern.permute.xlu1 %v4703_v1 }
  0x1b   : > { %s3944_s21 = sshll.u32 %s278_s20, 2  ;;  %s6018_s29 = scalar_lea.hbm %s6074_s6, %s4102_s18 }
  0x1c   : > { %s3945_s15 = sshll.u32 %s282_s14, 1  ;;  %s4105_s16 = sshll.u32 %s282_s14, 9 }
  0x1d   : > { %s287_s19 = scalar_lea.vmem %s6068_s0, %s3945_s15  ;;  %s4816_s22 = scalar_lea.vmem %s6069_s1, %s4105_s16 }
  0x1e   : > { %v293_v3 = vld [vmem:[%s287_s19] sm:$0x3]  ;;  %v2094_v5 = vld [vmem:[%s4816_s22 + $0x10] sm:$0xff]  ;;  %v2093_v7 = vld [vmem:[%s4816_s22 + $0x8] sm:$0xff]  ;;  %s2160_s19 = sld [smem:[#allocation2]]  ;;  %s5899_s13 = scalar_lea.vmem [#allocation3], %s3944_s21 }
  0x1f   : > { %v2092_v4 = vld [vmem:[%s4816_s22] sm:$0xff]  ;;  %4211 = vmatprep.subr.msk.mxu0 %vm327_vm1, %v293_v3  ;;  %2173 = vperm.xlu1 %4588, %v2094_v5   ;;  %v2095_v8 = vld [vmem:[%s4816_s22 + $0x18] sm:$0xff]  ;;  %v2097_v11 = vld [vmem:[%s4816_s22 + $0x28] sm:$0xff]  ;;  %s4710_s26 = smov [#allocation3]  }
  0x20   : > { %2163 = vperm.xlu0 %4587, %v2092_v4   ;;  %4212 = vmatpush3.msk.msra.mxu0 %vm327_vm1, %v293_v3  ;;  %v2096_v10 = vld [vmem:[%s4816_s22 + $0x20] sm:$0xff]  ;;  %v2098_v12 = vld [vmem:[%s4816_s22 + $0x30] sm:$0xff]  ;;  %v2099_v13 = vld [vmem:[%s4816_s22 + $0x38] sm:$0xff]  ;;  %s4627_s9 = sshll.u32 %s4710_s26, 4  ;;  %s4628_s9 = int_to_ptr.vmem [resolvable:$false] %s4627_s9 }
  0x21   : > { %4214 = vmatmul.mubr.msk.f32.vlgmr.msra.gmra.mrb[0].mxu0 %vm302_vm0, %v295_v2  ;;  %v2108_v14 = vld [vmem:[%s4816_s22 + $0x80] sm:$0xff]  ;;  %v2109_v15 = vld [vmem:[%s4816_s22 + $0x88] sm:$0xff]  ;;  %v2110_v16 = vld [vmem:[%s4816_s22 + $0x90] sm:$0xff]  ;;  %s4629_s12 = scalar_lea.vmem %s4628_s9, 128 }
  0x22   : > { %4216 = vmatprep.mubr.msk.f32.mxu0 %vm302_vm0, %v296_v6  ;;  %v2111_v17 = vld [vmem:[%s4816_s22 + $0x98] sm:$0xff]  ;;  %v2100_v18 = vld [vmem:[%s4816_s22 + $0x40] sm:$0xff]  ;;  %v2101_v19 = vld [vmem:[%s4816_s22 + $0x48] sm:$0xff] }
  0x23   : > { %2178 = vperm.xlu1 %4588, %v2095_v8   ;;  %v2102_v20 = vld [vmem:[%s4816_s22 + $0x50] sm:$0xff]  ;;  %v2103_v21 = vld [vmem:[%s4816_s22 + $0x58] sm:$0xff]  ;;  %v2112_v22 = vld [vmem:[%s4816_s22 + $0xa0] sm:$0xff] }
  0x24   : > { %2168 = vperm.xlu0 %4587, %v2093_v7   ;;  %v2113_v23 = vld [vmem:[%s4816_s22 + $0xa8] sm:$0xff]  ;;  %v2114_v24 = vld [vmem:[%s4816_s22 + $0xb0] sm:$0xff]  ;;  %v2115_v25 = vld [vmem:[%s4816_s22 + $0xb8] sm:$0xff] }
  0x25   : > { %4217 = vmatmul.mubr.msk.f32.gmra.mrb[2].mxu0 %vm302_vm0, %v297_v9  ;;  %v2124_v26 = vld [vmem:[%s4816_s22 + $0x100] sm:$0xff]  ;;  %v2125_v27 = vld [vmem:[%s4816_s22 + $0x108] sm:$0xff]  ;;  %v2126_v28 = vld [vmem:[%s4816_s22 + $0x110] sm:$0xff] }
  0x26   : > { %v2127_v29 = vld [vmem:[%s4816_s22 + $0x118] sm:$0xff]  ;;  %v2116_v30 = vld [vmem:[%s4816_s22 + $0xc0] sm:$0xff]  ;;  %v2117_v31 = vld [vmem:[%s4816_s22 + $0xc8] sm:$0xff] }
  0x27   : > { %2196 = vperm.xlu1 %4588, %v2097_v11   ;;  %v2118_v32 = vld [vmem:[%s4816_s22 + $0xd0] sm:$0xff]  ;;  %v2119_v33 = vld [vmem:[%s4816_s22 + $0xd8] sm:$0xff]  ;;  %v2128_v34 = vld [vmem:[%s4816_s22 + $0x120] sm:$0xff] }
  0x28   : > { %2191 = vperm.xlu0 %4587, %v2096_v10   ;;  %v2129_v35 = vld [vmem:[%s4816_s22 + $0x128] sm:$0xff]  ;;  %v2130_v36 = vld [vmem:[%s4816_s22 + $0x130] sm:$0xff]  ;;  %v2131_v37 = vld [vmem:[%s4816_s22 + $0x138] sm:$0xff] }
  0x29   : > { %v2140_v38 = vld [vmem:[%s4816_s22 + $0x180] sm:$0xff]  ;;  %v2141_v39 = vld [vmem:[%s4816_s22 + $0x188] sm:$0xff]  ;;  %v2142_v40 = vld [vmem:[%s4816_s22 + $0x190] sm:$0xff] }
  0x2a   : > { %v2143_v41 = vld [vmem:[%s4816_s22 + $0x198] sm:$0xff]  ;;  %v2132_v42 = vld [vmem:[%s4816_s22 + $0x140] sm:$0xff]  ;;  %v2133_v43 = vld [vmem:[%s4816_s22 + $0x148] sm:$0xff] }
  0x2b   : > { %2206 = vperm.xlu1 %4588, %v2099_v13   ;;  %v2134_v44 = vld [vmem:[%s4816_s22 + $0x150] sm:$0xff]  ;;  %v2135_v45 = vld [vmem:[%s4816_s22 + $0x158] sm:$0xff]  ;;  %v2144_v46 = vld [vmem:[%s4816_s22 + $0x1a0] sm:$0xff] }
  0x2c   : > { %2201 = vperm.xlu0 %4587, %v2098_v12   ;;  %v2145_v47 = vld [vmem:[%s4816_s22 + $0x1a8] sm:$0xff]  ;;  %v2146_v48 = vld [vmem:[%s4816_s22 + $0x1b0] sm:$0xff]  ;;  %v2147_v49 = vld [vmem:[%s4816_s22 + $0x1b8] sm:$0xff] }
  0x2d   : > { %v2148_v50 = vld [vmem:[%s4816_s22 + $0x1c0] sm:$0xff]  ;;  %v2149_v51 = vld [vmem:[%s4816_s22 + $0x1c8] sm:$0xff]  ;;  %v2150_v52 = vld [vmem:[%s4816_s22 + $0x1d0] sm:$0xff] }
  0x2e   : > { %v2151_v53 = vld [vmem:[%s4816_s22 + $0x1d8] sm:$0xff]  ;;  %v2104_v54 = vld [vmem:[%s4816_s22 + $0x60] sm:$0xff]  ;;  %v2105_v55 = vld [vmem:[%s4816_s22 + $0x68] sm:$0xff] }
  0x2f   : > { %2606 = vperm.xlu1 %4588, %v2109_v15   ;;  %v2120_v56 = vld [vmem:[%s4816_s22 + $0xe0] sm:$0xff]  ;;  %v2121_v57 = vld [vmem:[%s4816_s22 + $0xe8] sm:$0xff]  ;;  %v2106_v62 = vld [vmem:[%s4816_s22 + $0x70] sm:$0xff] }
  0x30   : > { %2601 = vperm.xlu0 %4587, %v2108_v14   ;;  %v2136_v58 = vld [vmem:[%s4816_s22 + $0x160] sm:$0xff]  ;;  %v2137_v59 = vld [vmem:[%s4816_s22 + $0x168] sm:$0xff]  ;;  %v2122_v63 = vld [vmem:[%s4816_s22 + $0xf0] sm:$0xff] }
  0x31   : > { %v2152_v60 = vld [vmem:[%s4816_s22 + $0x1e0] sm:$0xff]  ;;  %v2153_v61 = vld [vmem:[%s4816_s22 + $0x1e8] sm:$0xff]  ;;  %v2138_v0 = vld [vmem:[%s4816_s22 + $0x170] sm:$0xff] }
  0x32   : > { %v2154_v1 = vld [vmem:[%s4816_s22 + $0x1f0] sm:$0xff]  ;;  %v2107_v2 = vld [vmem:[%s4816_s22 + $0x78] sm:$0xff]  ;;  %v2156_v3 = vld [vmem:[%s6072_s4] sm:$0xff] }
  0x33   : > { %2616 = vperm.xlu1 %4588, %v2111_v17   ;;  %v2157_v4 = vld [vmem:[%s6072_s4 + $0x8] sm:$0xff]  ;;  %v2123_v5 = vld [vmem:[%s4816_s22 + $0xf8] sm:$0xff]  ;;  %v2158_v8 = vld [vmem:[%s6072_s4 + $0x10] sm:$0xff] }
  0x34   : > { %2611 = vperm.xlu0 %4587, %v2110_v16   ;;  %v2139_v6 = vld [vmem:[%s4816_s22 + $0x178] sm:$0xff]  ;;  %v2185_v10 = vld [vmem:[%s6071_s3] sm:$0xff] }
  0x35   : > { %v2155_v7 = vld [vmem:[%s4816_s22 + $0x1f8] sm:$0xff]  ;;  %4233 = vmatprep.mubr.msk.f32.mxu1 %vm2209_vm2, %v2185_v10  ;;  %s3842_s22 = scalar_lea.sflag [#allocation4], %s278_s20 }
  0x36   : > { %v2159_v9 = vld [vmem:[%s6072_s4 + $0x18] sm:$0xff] }
  0x37   : > { %2323 = vperm.xlu1 %4588, %v2101_v19  }
  0x38   : > { %2318 = vperm.xlu0 %4587, %v2100_v18  }
  0x3b   : > { %2333 = vperm.xlu1 %4588, %v2103_v21  }
  0x3c   : > { %2328 = vperm.xlu0 %4587, %v2102_v20  }
  0x3f   : > { %2634 = vperm.xlu1 %4588, %v2113_v23  }
  0x40   : > { %2629 = vperm.xlu0 %4587, %v2112_v22  }
  0x43   : > { %2644 = vperm.xlu1 %4588, %v2115_v25  }
  0x44   : > { %2639 = vperm.xlu0 %4587, %v2114_v24  }
  0x47   : > { %3020 = vperm.xlu1 %4588, %v2125_v27  }
  0x48   : > { %3015 = vperm.xlu0 %4587, %v2124_v26  }
  0x4b   : > { %3030 = vperm.xlu1 %4588, %v2127_v29  }
  0x4c   : > { %3025 = vperm.xlu0 %4587, %v2126_v28  }
  0x4f   : > { %2759 = vperm.xlu1 %4588, %v2117_v31   ;;  %v298_v31 = vld [vmem:[%s6070_s2 + $0x20] sm:$0xff] }
  0x50   : > { %2754 = vperm.xlu0 %4587, %v2116_v30   ;;  %4219 = vmatprep.mubr.msk.f32.mxu0 %vm302_vm0, %v298_v31 }
  0x53   : > { %2769 = vperm.xlu1 %4588, %v2119_v33  }
  0x54   : > { %2764 = vperm.xlu0 %4587, %v2118_v32  }
  0x57   : > { %3048 = vperm.xlu1 %4588, %v2129_v35  }
  0x58   : > { %3043 = vperm.xlu0 %4587, %v2128_v34  }
  0x5b   : > { %3058 = vperm.xlu1 %4588, %v2131_v37   ;;  %v299_v37 = vld [vmem:[%s6070_s2 + $0x28] sm:$0xff] }
  0x5c   : > { %3053 = vperm.xlu0 %4587, %v2130_v36   ;;  %4220 = vmatmul.mubr.msk.f32.gmra.mrb[4].mxu0 %vm302_vm0, %v299_v37 }
  0x5f   : > { %3434 = vperm.xlu1 %4588, %v2141_v39  }
  0x60   : > { %3429 = vperm.xlu0 %4587, %v2140_v38  }
  0x63   : > { %3444 = vperm.xlu1 %4588, %v2143_v41  }
  0x64   : > { %3439 = vperm.xlu0 %4587, %v2142_v40  }
  0x67   : > { %3173 = vperm.xlu1 %4588, %v2133_v43  }
  0x68   : > { %3168 = vperm.xlu0 %4587, %v2132_v42  }
  0x6b   : > { %3183 = vperm.xlu1 %4588, %v2135_v45  }
  0x6c   : > { %3178 = vperm.xlu0 %4587, %v2134_v44  }
  0x6f   : > { %3462 = vperm.xlu1 %4588, %v2145_v47   ;;  %v6082_v47 = vmov 683565275  }
  0x70   : > { %3457 = vperm.xlu0 %4587, %v2144_v46  }
  0x73   : > { %3472 = vperm.xlu1 %4588, %v2147_v49  }
  0x74   : > { %3467 = vperm.xlu0 %4587, %v2146_v48  }
  0x77   : > { %3587 = vperm.xlu1 %4588, %v2149_v51   ;;  %v6086_v51 = vmov 2475754826  }
  0x78   : > { %3582 = vperm.xlu0 %4587, %v2148_v50  }
  0x7b   : > { %3597 = vperm.xlu1 %4588, %v2151_v53   ;;  %v6075_v53 = vmov 2131351028  }
  0x7c   : > { %3592 = vperm.xlu0 %4587, %v2150_v52  }
  0x7f   : > { %2449 = vperm.xlu1 %4588, %v2105_v55   ;;  %v6088_v55 = vmov 2102212464  }
  0x80   : > { %2444 = vperm.xlu0 %4587, %v2104_v54  }
  0x83   : > { %2884 = vperm.xlu1 %4588, %v2121_v57   ;;  %v6078_v57 = vmov 920167782  }
  0x84   : > { %2879 = vperm.xlu0 %4587, %v2120_v56  }
  0x87   : > { %3298 = vperm.xlu1 %4588, %v2137_v59  }
  0x88   : > { %3293 = vperm.xlu0 %4587, %v2136_v58  }
  0x8b   : > { %3712 = vperm.xlu1 %4588, %v2153_v61  }
  0x8c   : > { %3707 = vperm.xlu0 %4587, %v2152_v60  }
  0x8f   : > { %2889 = vperm.xlu1 %4588, %v2122_v63  }
  0x90   : > { %2454 = vperm.xlu0 %4587, %v2106_v62  }
  0x93   : > { %3717 = vperm.xlu1 %4588, %v2154_v1   ;;  %v6080_v1 = vmov 1326507024  }
  0x94   : > { %3303 = vperm.xlu0 %4587, %v2138_v0  }
  0x97   : > { %2565 = vperm.xlu1 %4588, %v2156_v3  }
  0x98   : > { %2459 = vperm.xlu0 %4587, %v2107_v2  }
  0x9b   : > { %2894 = vperm.xlu1 %4588, %v2123_v5  }
  0x9c   : > { %2570 = vperm.xlu0 %4587, %v2157_v4  }
  0x9e   : > { %v4910_v11 = vpop.permute.xlu1 %2173 }
  0x9f   : > { %3722 = vperm.xlu1 %4588, %v2155_v7   ;;  %v4912_v12 = vpop.permute.xlu0 %2163 }
  0xa0   : > { %3308 = vperm.xlu0 %4587, %v2139_v6  }
  0xa2   : > { %v4914_v13 = vpop.permute.xlu1 %2178 }
  0xa3   : > { %2580 = vperm.xlu1 %4588, %v2159_v9   ;;  %v4916_v14 = vpop.permute.xlu0 %2168 }
  0xa4   : > { %2575 = vperm.xlu0 %4587, %v2158_v8  }
  0xa6   : > { %v4918_v15 = vpop.permute.xlu1 %2196 }
  0xa7   : > { %v4922_v17 = vpop.permute.xlu0 %2191 }
  0xaa   : > { %v4929_v23 = vpop.permute.xlu1 %2206 }
  0xab   : > { %v4941_v32 = vpop.permute.xlu0 %2201 }
  0xae   : > { %v4952_v38 = vpop.permute.xlu1 %2606 }
  0xaf   : > { %v4957_v45 = vpop.permute.xlu0 %2601 }
  0xb2   : > { %v4969_v62 = vpop.permute.xlu1 %2616 }
  0xb3   : > { %v4974_v9 = vpop.permute.xlu0 %2611 }
  0xb6   : > { %v4982_v37 = vpop.permute.xlu1 %2323 }
  0xf4   : > { %v4920_v16 = vpop.f32.mrb[0].mxu0 }
  0xf5   : > { %v540_v18 = vand.u32 2147483647, %v4920_v16  ;;  %v543_v19 = vand.u32 2139095040, %v4920_v16  ;;  %v4926_v20 = vpop.f32.mrb[1].mxu0 }
  0xf6   : > { %v439_v21 = vand.u32 2139095040, %v4926_v20  ;;  %v436_v25 = vand.u32 2147483647, %v4926_v20 }
  0xf7   : > { %v544_v22 = vshrl.u32 %v543_v19, 23  ;;  %v547_v24 = vand.u32 8388607, %v540_v18 }
  0xf8   : > { %v440_v26 = vshrl.u32 %v439_v21, 23  ;;  %v4934_v27 = vpop.f32.mrb[2].mxu0  ;;  %v4946_v35 = vand.u32 8388607, %v436_v25 }
  0xf9   : > { %v3961_v28 = vadd.s32 4294967169, %v544_v22  ;;  %v4936_v29 = vpop.f32.mrb[3].mxu0  ;;  %v548_v34 = vor.u32 8388608, %v547_v24 }
  0xfa   : > { %v3957_v30 = vadd.s32 4294967169, %v440_v26  ;;  %v444_v44 = vor.u32 8388608, %v4946_v35 }
  0xfb   : > { %v550_v33 = vadd.s32 1, %v3961_v28  ;;  %v4954_v43 = vshll.u32 %v548_v34, 8 }
  0xfc   : > { %v446_v36 = vadd.s32 1, %v3957_v30 }
  0xfd   : > { %vm551_vm3 = vcmp.gt.s32.totalorder %v550_v33, 0 }
  0xfe   : > { %v552_v39 = vsel %vm551_vm3, %v550_v33, 0  ;;  %vm447_vm4 = vcmp.gt.s32.totalorder %v446_v36, 0  ;;  %vm542_vm3 = vcmp.lt.s32.totalorder %v4920_v16, 0 }
  0xff   : > { %v553_v40 = vshrl.u32 %v552_v39, 5  ;;  %v554_v41 = vand.u32 31, %v552_v39  ;;  %v448_v42 = vsel %vm447_vm4, %v446_v36, 0  ;;  %vm541_vm4 = vcmp.le.f32.partialorder %v540_v18, 0.7853982 }
 0x100   : > { %v4960_v49 = vshrl.u32 %v448_v42, 5  ;;  %v450_v50 = vand.u32 31, %v448_v42 }
 0x101   : > { %v555_v46 = vsub.s32 32, %v554_v41  ;;  %v557_v48 = vshll.u32 %v6082_v47, %v554_v41  ;;  %v560_v52 = vshll.u32 %v6086_v51, %v554_v41  ;;  %v563_v54 = vshll.u32 %v6075_v53, %v554_v41 }
 0x102   : > { %v566_v56 = vshll.u32 %v6088_v55, %v554_v41  ;;  %v569_v58 = vshll.u32 %v6078_v57, %v554_v41  ;;  %vm572_vm5 = vcmp.lt.s32.totalorder %v553_v40, 1  ;;  %vm573_vm6 = vcmp.lt.s32.totalorder %v553_v40, 2 }
 0x103   : > { %v558_v59 = vshrl.u32 %v6086_v51, %v555_v46  ;;  %v561_v60 = vshrl.u32 %v6075_v53, %v555_v46  ;;  %v564_v61 = vshrl.u32 %v6088_v55, %v555_v46  ;;  %v556_v63 = vshrl.u32 %v6082_v47, %v555_v46 }
 0x104   : > { %v567_v0 = vshrl.u32 %v6078_v57, %v555_v46  ;;  %v570_v2 = vshrl.u32 %v6080_v1, %v555_v46  ;;  %v451_v6 = vsub.s32 32, %v450_v50  ;;  %vm574_vm7 = vcmp.lt.s32.totalorder %v553_v40, 3 }
 0x105   : > { %v559_v3 = vor.u32 %v558_v59, %v557_v48  ;;  %v562_v4 = vor.u32 %v561_v60, %v560_v52  ;;  %v565_v5 = vor.u32 %v564_v61, %v563_v54  ;;  %vm575_vm8 = vcmp.lt.s32.totalorder %v553_v40, 4 }
 0x106   : > { %v568_v7 = vor.u32 %v567_v0, %v566_v56  ;;  %v571_v8 = vor.u32 %v570_v2, %v569_v58  ;;  %v453_v30 = vshll.u32 %v6082_v47, %v450_v50  ;;  %v454_v34 = vshrl.u32 %v6086_v51, %v451_v6 }
 0x107   : > { %v576_v10 = vsel %vm572_vm5, %v556_v63, %v559_v3  ;;  %v577_v19 = vsel %vm575_vm8, %v565_v5, 2102212464  ;;  %v580_v21 = vsel %vm572_vm5, %v559_v3, %v562_v4  ;;  %v584_v22 = vsel %vm572_vm5, %v562_v4, %v565_v5  ;;  %v4999_v63 = vpop.permute.xlu0 %2318 }
 0x108   : > { %v578_v24 = vsel %vm574_vm7, %v562_v4, %v577_v19  ;;  %v581_v26 = vsel %vm575_vm8, %v568_v7, 920167782  ;;  %v585_v28 = vsel %vm575_vm8, %v571_v8, 1326507024  ;;  %v456_v36 = vshll.u32 %v6086_v51, %v450_v50 }
 0x109   : > { %v582_v31 = vsel %vm574_vm7, %v565_v5, %v581_v26  ;;  %v586_v33 = vsel %vm574_vm7, %v568_v7, %v585_v28  ;;  %v579_v39 = vsel %vm573_vm6, %v576_v10, %v578_v24  ;;  %v457_v46 = vshrl.u32 %v6075_v53, %v451_v6 }
 0x10a   : > { %v583_v41 = vsel %vm573_vm6, %v580_v21, %v582_v31  ;;  %v587_v42 = vsel %vm573_vm6, %v584_v22, %v586_v33  ;;  %v455_v58 = vor.u32 %v454_v34, %v453_v30  ;;  %v459_v60 = vshll.u32 %v6075_v53, %v450_v50  ;;  %v5013_v21 = vpop.permute.xlu1 %2333 }
 0x10b   : > { %v4989_v48 = vmul.u32.u64.low %v4954_v43, %v587_v42  ;;  %v4990_v52 = vmul.u32.u64.high %v4954_v43, %v587_v42, %v4989_v48  ;;  %v4993_v54 = vmul.u32.u64.low %v4954_v43, %v583_v41  ;;  %v4994_v56 = vmul.u32.u64.high %v4954_v43, %v583_v41, %v4993_v54  ;;  %v5019_v30 = vpop.permute.xlu0 %2328 }
 0x10c   : > { %v458_v59 = vor.u32 %v457_v46, %v456_v36  ;;  %v460_v61 = vshrl.u32 %v6088_v55, %v451_v6  ;;  %v462_v40 = vshll.u32 %v6088_v55, %v450_v50  ;;  %v463_v0 = vshrl.u32 %v6078_v57, %v451_v6 }
 0x10d   : > { %v466_v2 = vshrl.u32 %v6080_v1, %v451_v6  ;;  %v484_v3 = vshll.u32 %v444_v44, 8  ;;  %v595_v4 = vmul.u32 %v4954_v43, %v579_v39  ;;  %v452_v5 = vshrl.u32 %v6082_v47, %v451_v6 }
 0x10e   : > { %v461_v7 = vor.u32 %v460_v61, %v459_v60  ;;  %v465_v8 = vshll.u32 %v6078_v57, %v450_v50  ;;  %vm597_vm9 = vc.u32 %v4990_v52, %v4993_v54  ;;  %v598_v10 = vadd.s32 1, %v4994_v56  ;;  %v5027_v60 = vpop.permute.xlu1 %2634 }
 0x10f   : > { %v464_v19 = vor.u32 %v463_v0, %v462_v40  ;;  %vm468_vm10 = vcmp.lt.s32.totalorder %v4960_v49, 1  ;;  %vm470_vm11 = vcmp.lt.s32.totalorder %v4960_v49, 3  ;;  %vm471_vm12 = vcmp.lt.s32.totalorder %v4960_v49, 4 }
 0x110   : > { %v467_v22 = vor.u32 %v466_v2, %v465_v8  ;;  %v476_v35 = vsel %vm468_vm10, %v455_v58, %v458_v59  ;;  %v599_v43 = vsel %vm597_vm9, %v598_v10, %v4994_v56  ;;  %v473_v44 = vsel %vm471_vm12, %v461_v7, 2102212464 }
 0x111   : > { %v477_v50 = vsel %vm471_vm12, %v464_v19, 920167782  ;;  %v480_v6 = vsel %vm468_vm10, %v458_v59, %v461_v7  ;;  %v600_v24 = vadd.s32 %v599_v43, %v595_v4  ;;  %vm469_vm13 = vcmp.lt.s32.totalorder %v4960_v49, 2 }
 0x112   : > { %v478_v26 = vsel %vm470_vm11, %v461_v7, %v477_v50  ;;  %v481_v28 = vsel %vm471_vm12, %v467_v22, 1326507024  ;;  %v472_v31 = vsel %vm468_vm10, %v452_v5, %v455_v58  ;;  %v474_v33 = vsel %vm470_vm11, %v458_v59, %v473_v44  ;;  %v5033_v59 = vpop.permute.xlu0 %2629  ;;  %v5037_v7 = vpop.permute.xlu1 %2644 }
 0x113   : > { %v479_v34 = vsel %vm469_vm13, %v476_v35, %v478_v26  ;;  %v482_v36 = vsel %vm470_vm11, %v464_v19, %v481_v28  ;;  %v601_v39 = vadd.s32 536870912, %v600_v24  ;;  %v475_v49 = vsel %vm469_vm13, %v472_v31, %v474_v33 }
 0x114   : > { %v483_v41 = vsel %vm469_vm13, %v480_v6, %v482_v36  ;;  %v5021_v42 = vmul.u32.u64.low %v484_v3, %v479_v34  ;;  %v5022_v46 = vmul.u32.u64.high %v484_v3, %v479_v34, %v5021_v42  ;;  %v491_v0 = vmul.u32 %v484_v3, %v475_v49 }
 0x115   : > { %v5024_v48 = vmul.u32.u64.low %v484_v3, %v483_v41  ;;  %v5025_v56 = vmul.u32.u64.high %v484_v3, %v483_v41, %v5024_v48  ;;  %v5029_v61 = vshrl.u32 %v601_v39, 30  ;;  %v596_v31 = vadd.s32 %v4993_v54, %v4990_v52 }
 0x116   : > { %v494_v58 = vadd.s32 1, %v5022_v46  ;;  %v5039_v22 = vpop.permute.xlu0 %2639  ;;  %v5044_v50 = vpop.permute.xlu1 %3020  ;;  %vm438_vm5 = vcmp.lt.s32.totalorder %v4926_v20, 0  ;;  %vm437_vm6 = vcmp.le.f32.partialorder %v436_v25, 0.7853982  ;;  %vm528_vm13 = vweird.f32 %v4926_v20 }
 0x117   : > { %v603_v40 = vshll.u32 %v5029_v61, 30  ;;  %vm493_vm14 = vc.u32 %v5025_v56, %v5021_v42 }
 0x118   : > { %v495_v4 = vsel %vm493_vm14, %v494_v58, %v5022_v46  ;;  %vm632_vm14 = vweird.f32 %v4920_v16 }
 0x119   : > { %v604_v2 = vsub.s32 %v600_v24, %v603_v40  ;;  %v496_v5 = vadd.s32 %v495_v4, %v491_v0 }
 0x11a   : > { %v5046_v24 = vpop.permute.xlu0 %3015  ;;  %v5050_v39 = vpop.permute.xlu1 %3030 }
 0x11b   : > { %v606_v8 = vsub.s32 0, %v604_v2  ;;  %v497_v10 = vadd.s32 536870912, %v496_v5 }
 0x11d   : > { %v3962_v19 = vmin.u32 %v606_v8, %v604_v2  ;;  %v5041_v35 = vshrl.u32 %v497_v10, 30 }
 0x11e   : > { %v5052_v0 = vpop.permute.xlu0 %3025  ;;  %v5054_v8 = vpop.permute.xlu1 %2759 }
 0x11f   : > { %v608_v43 = vclz %v3962_v19  ;;  %v499_v44 = vshll.u32 %v5041_v35, 30  ;;  %v492_v19 = vadd.s32 %v5021_v42, %v5025_v56 }
 0x121   : > { %v3963_v3 = vadd.s32 4294967294, %v608_v43  ;;  %v500_v6 = vsub.s32 %v496_v5, %v499_v44 }
 0x122   : > { %v5063_v42 = vpop.permute.xlu1 %2769 }
 0x123   : > { %vm3964_vm15 = vcmp.lt.s32.totalorder %v3963_v3, 0  ;;  %v502_v28 = vsub.s32 0, %v500_v6 }
 0x124   : > { %v611_v26 = vsel %vm3964_vm15, 0, %v3963_v3  ;;  %v5057_v3 = vpop.permute.xlu0 %2754 }
 0x125   : > { %v612_v33 = vsub.s32 32, %v611_v26  ;;  %v616_v34 = vsub.s32 4294967266, %v611_v26  ;;  %v3958_v36 = vmin.u32 %v502_v28, %v500_v6  ;;  %v613_v41 = vshll.u32 %v604_v2, %v611_v26 }
 0x126   : > { %v626_v26 = vsub.s32 4, %v5029_v61 }
 0x127   : > { %v614_v46 = vshrl.u32 %v596_v31, %v612_v33  ;;  %v617_v48 = vadd.s32 127, %v616_v34  ;;  %v504_v49 = vclz %v3958_v36 }
 0x128   : > { %v627_v56 = vsel %vm542_vm3, %v626_v26, %v5029_v61 }
 0x129   : > { %v615_v40 = vor.u32 %v614_v46, %v613_v41  ;;  %v618_v58 = vshll.u32 %v617_v48, 23  ;;  %v3959_v4 = vadd.s32 4294967294, %v504_v49 }
 0x12b   : > { %v619_v5 = vor.u32 4788187, %v618_v58  ;;  %vm3960_vm1 = vcmp.lt.s32.totalorder %v3959_v4, 0  ;;  %v622_v52 = vcvt.s32.f32 %v615_v40 }
 0x12c   : > { %v507_v54 = vsel %vm3960_vm1, 0, %v3959_v4  ;;  %v629_v4 = vsel %vm541_vm4, 0, %v627_v56 }
 0x12d   : > { %v620_v10 = vand.u32 2147483647, %v619_v5  ;;  %v508_v43 = vsub.s32 32, %v507_v54  ;;  %v512_v44 = vsub.s32 4294967266, %v507_v54  ;;  %v509_v28 = vshll.u32 %v500_v6, %v507_v54  ;;  %v5067_v6 = vpop.permute.xlu0 %2764 }
 0x12e   : > { %6095 = vst [vmem:[#allocation6_spill] sm:$0xff] %v5067_v6  ;;  %v633_v18 = vadd.s32 3, %v629_v4 }
 0x12f   : > { %v623_v2 = vmul.f32 %v622_v52, %v620_v10  ;;  %v510_v31 = vshrl.u32 %v492_v19, %v508_v43  ;;  %v513_v33 = vadd.s32 127, %v512_v44  ;;  %v522_v10 = vsub.s32 4, %v5041_v35  ;;  %v5070_v52 = vpop.permute.xlu1 %3048 }
 0x130   : > { %6096 = vst [vmem:[#allocation7_spill] sm:$0xff] %v5070_v52  ;;  %v634_v26 = vand.u32 3, %v633_v18 }
 0x131   : > { %v624_v34 = vxor.u32 2147483648, %v623_v2  ;;  %v511_v36 = vor.u32 %v510_v31, %v509_v28  ;;  %v514_v41 = vshll.u32 %v513_v33, 23  ;;  %v5073_v61 = vpop.permute.xlu0 %3043  ;;  %v523_v43 = vsel %vm438_vm5, %v522_v10, %v5041_v35 }
 0x132   : > { %6097 = vst [vmem:[#allocation8_spill] sm:$0xff] %v5073_v61  ;;  %v525_v31 = vsel %vm437_vm6, 0, %v523_v43  ;;  %vm636_vm8 = vcmp.eq.s32.totalorder %v634_v26, 0  ;;  %vm639_vm9 = vcmp.eq.s32.totalorder %v634_v26, 2  ;;  %vm635_vm11 = vcmp.lt.s32.totalorder %v634_v26, 2 }
 0x133   : > { %v625_v46 = vsel %vm542_vm3, %v624_v34, %v623_v2  ;;  %v515_v49 = vor.u32 4788187, %v514_v41  ;;  %v518_v58 = vcvt.s32.f32 %v511_v36  ;;  %v1464_v2 = vand.u32 3, %v629_v4  ;;  %v5079_v33 = vpop.permute.xlu1 %3058 }
 0x134   : > { %v628_v48 = vsel %vm541_vm4, %v4920_v16, %v625_v46  ;;  %6098 = vst [vmem:[#allocation9_spill] sm:$0xff] %v5079_v33  ;;  %v529_v46 = vadd.s32 3, %v525_v31 }
 0x135   : > { %4589 = vcosq.f32 %v628_v48  ;;  %v516_v40 = vand.u32 2147483647, %v515_v49  ;;  %vm1466_vm7 = vcmp.eq.s32.totalorder %v1464_v2, 0  ;;  %v5081_v56 = vpop.permute.xlu0 %3053  ;;  %vm1469_vm10 = vcmp.eq.s32.totalorder %v1464_v2, 2 }
 0x136   : > { %4591 = vsinq.f32 %v628_v48  ;;  %6099 = vst [vmem:[#allocation10_spill] sm:$0xff] %v5081_v56  ;;  %vm1465_vm12 = vcmp.lt.s32.totalorder %v1464_v2, 2  ;;  %v530_v4 = vand.u32 3, %v529_v46 }
 0x137   : > { %v519_v5 = vmul.f32 %v518_v58, %v516_v40  ;;  %v3435_v40 = vpop.permute.xlu1 %3434  ;;  %v1361_v58 = vand.u32 3, %v525_v31 }
 0x138   : > { %vm535_vm1 = vcmp.eq.s32.totalorder %v530_v4, 2 }
 0x139   : > { %v520_v54 = vxor.u32 2147483648, %v519_v5  ;;  %vm1362_vm15 = vcmp.lt.s32.totalorder %v1361_v58, 2  ;;  %vm1363_vm3 = vcmp.eq.s32.totalorder %v1361_v58, 0  ;;  %vm1366_vm4 = vcmp.eq.s32.totalorder %v1361_v58, 2 }
 0x13b   : > { %v521_v19 = vsel %vm438_vm5, %v520_v54, %v519_v5  ;;  %v3430_v54 = vpop.permute.xlu0 %3429  ;;  %vm531_vm5 = vcmp.lt.s32.totalorder %v530_v4, 2  ;;  %v3445_v31 = vpop.permute.xlu1 %3444 }
 0x13c   : > { %v524_v44 = vsel %vm437_vm6, %v4926_v20, %v521_v19  ;;  %vm532_vm6 = vcmp.eq.s32.totalorder %v530_v4, 0 }
 0x13d   : > { %4593 = vcosq.f32 %v524_v44 }
 0x13e   : > { %4595 = vsinq.f32 %v524_v44 }
 0x13f   : > { %v4590_v28 = vpop.eup %4589 }
 0x140   : > { %v4592_v34 = vpop.eup %4591  ;;  %v640_v36 = vxor.u32 2147483648, %v4590_v28 }
 0x141   : > { %v637_v41 = vxor.u32 2147483648, %v4592_v34 }
 0x142   : > { %v641_v35 = vsel %vm639_vm9, %v640_v36, %v4592_v34  ;;  %v1471_v49 = vsel %vm1469_vm10, %v640_v36, %v4592_v34 }
 0x143   : > { %v638_v25 = vsel %vm636_vm8, %v4590_v28, %v637_v41  ;;  %v1468_v48 = vsel %vm1466_vm7, %v4590_v28, %v637_v41 }
 0x144   : > { %v642_v5 = vsel %vm635_vm11, %v638_v25, %v641_v35  ;;  %v1472_v10 = vsel %vm1465_vm12, %v1468_v48, %v1471_v49 }
 0x145   : > { %v643_v44 = vsel %vm632_vm14, nan, %v642_v5  ;;  %v1473_v53 = vsel %vm632_vm14, nan, %v1472_v10  ;;  %v3440_v5 = vpop.permute.xlu0 %3439 }
 0x146   : > { %v3448_v36 = vmul.f32 %v3435_v40, %v643_v44  ;;  %v3450_v46 = vmul.f32 %v3445_v31, %v1473_v53  ;;  %v2182_v35 = vmul.f32 %v4916_v14, %v643_v44  ;;  %v2184_v48 = vmul.f32 %v4914_v13, %v1473_v53 }
 0x147   : > { %v4594_v18 = vpop.eup %4593  ;;  %v2620_v10 = vmul.f32 %v4952_v38, %v643_v44  ;;  %v2622_v14 = vmul.f32 %v4969_v62, %v1473_v53  ;;  %v3034_v13 = vmul.f32 %v5044_v50, %v643_v44  ;;  %v647_v44 = vand.u32 2139095040, %v4936_v29 }
 0x148   : > { %v4596_v19 = vpop.eup %4595  ;;  %v536_v43 = vxor.u32 2147483648, %v4594_v18 }
 0x149   : > { %v533_v28 = vxor.u32 2147483648, %v4596_v19 }
 0x14a   : > { %v537_v2 = vsel %vm535_vm1, %v536_v43, %v4596_v19  ;;  %v1368_v26 = vsel %vm1366_vm4, %v536_v43, %v4596_v19 }
 0x14b   : > { %v534_v34 = vsel %vm532_vm6, %v4594_v18, %v533_v28  ;;  %v1365_v41 = vsel %vm1363_vm3, %v4594_v18, %v533_v28  ;;  %v3036_v28 = vmul.f32 %v5050_v39, %v1473_v53  ;;  %v5117_v39 = vld [vmem:[%s6071_s3 + $0x8] sm:$0xff]  ;;  %vm750_vm6 = vcmp.lt.s32.totalorder %v4934_v27, 0 }
 0x14c   : > { %v538_v25 = vsel %vm531_vm5, %v534_v34, %v537_v2  ;;  %v1369_v16 = vsel %vm1362_vm15, %v1365_v41, %v1368_v26  ;;  %v648_v34 = vshrl.u32 %v647_v44, 23 }
 0x14d   : > { %v539_v49 = vsel %vm528_vm13, nan, %v538_v25  ;;  %v1370_v4 = vsel %vm528_vm13, nan, %v1369_v16 }
 0x14e   : > { %v3447_v19 = vmul.f32 %v3430_v54, %v539_v49  ;;  %v3449_v40 = vmul.f32 %v3440_v5, %v1370_v4  ;;  %v2181_v18 = vmul.f32 %v4912_v12, %v539_v49  ;;  %v2183_v58 = vmul.f32 %v4910_v11, %v1370_v4 }
 0x14f   : > { %v2619_v43 = vmul.f32 %v4957_v45, %v539_v49  ;;  %v2621_v12 = vmul.f32 %v4974_v9, %v1370_v4  ;;  %v3033_v11 = vmul.f32 %v5046_v24, %v539_v49  ;;  %v3035_v45 = vmul.f32 %v5052_v0, %v1370_v4  ;;  %v5122_v9 = vld [vmem:[%s6071_s3 + $0x10] sm:$0xff]  ;;  %v5131_v24 = vld [vmem:[%s6071_s3 + $0x18] sm:$0xff] }
 0x150   : > { %v5099_v2 = vpack.c.bf16 %v3448_v36, %v3447_v19  ;;  %v5101_v20 = vpack.c.bf16 %v3450_v46, %v3449_v40  ;;  %v4393_v26 = vpack.c.bf16 %v2182_v35, %v2181_v18  ;;  %v4397_v38 = vpack.c.bf16 %v2184_v48, %v2183_v58 }
 0x151   : > { %v5103_v54 = vpack.c.bf16 %v2620_v10, %v2619_v43  ;;  %v5108_v62 = vpack.c.bf16 %v2622_v14, %v2621_v12  ;;  %v5110_v53 = vpack.c.bf16 %v3034_v13, %v3033_v11  ;;  %v5112_v50 = vpack.c.bf16 %v3036_v28, %v3035_v45 }
 0x152   : > { %6100 = vst [vmem:[#allocation11_spill] sm:$0xff] %v5099_v2  ;;  %6101 = vst [vmem:[#allocation12_spill] sm:$0xff] %v5101_v20  ;;  %4394 = vmatprep.subr.bf16.mxu1 %v4393_v26  ;;  %v751_v0 = vand.u32 2139095040, %v4934_v27  ;;  %v3965_v41 = vadd.s32 4294967169, %v648_v34  ;;  %v6077_v4 = vand.u32 2147483647, %v4934_v27 }
 0x153   : > { %4396 = vmatpush3.bf16.msra.mxu1 %v4393_v26  ;;  %v6090_v18 = vand.u32 2147483647, %v4936_v29  ;;  %v6102_v12 = vmov 2131351028  }
 0x154   : > { %4398 = vmatprep.subr.bf16.mxu1 %v4397_v38  ;;  %v752_v31 = vshrl.u32 %v751_v0, 23  ;;  %v654_v25 = vadd.s32 1, %v3965_v41  ;;  %v755_v58 = vand.u32 8388607, %v6077_v4 }
 0x156   : > { %v3969_v36 = vadd.s32 4294967169, %v752_v31  ;;  %vm655_vm8 = vcmp.gt.s32.totalorder %v654_v25, 0  ;;  %v756_v2 = vor.u32 8388608, %v755_v58 }
 0x157   : > { %4400 = vmatpush3.bf16.msra.mxu1 %v4397_v38  ;;  %v656_v48 = vsel %vm655_vm8, %v654_v25, 0 }
 0x158   : > { %v758_v46 = vadd.s32 1, %v3969_v36  ;;  %v658_v49 = vand.u32 31, %v656_v48  ;;  %v5165_v36 = vshrl.u32 %v656_v48, 5 }
 0x15a   : > { %4234 = vmatmul.mubr.msk.f32.vlgmr.msra.gmra.mrb[0].mxu1 %vm2209_vm2, %v5117_v39  ;;  %vm759_vm7 = vcmp.gt.s32.totalorder %v758_v46, 0  ;;  %v5140_v10 = vsub.s32 32, %v658_v49  ;;  %v670_v44 = vshll.u32 %v6088_v55, %v658_v49  ;;  %v673_v41 = vshll.u32 %v6078_v57, %v658_v49 }
 0x15b   : > { %4236 = vmatprep.mubr.msk.f32.mxu1 %vm2209_vm2, %v5122_v9  ;;  %v760_v16 = vsel %vm759_vm7, %v758_v46, 0  ;;  %v667_v48 = vshll.u32 %v6102_v12, %v658_v49  ;;  %vm679_vm10 = vcmp.lt.s32.totalorder %v5165_v36, 4  ;;  %vm676_vm13 = vcmp.lt.s32.totalorder %v5165_v36, 1 }
 0x15c   : > { %v762_v35 = vand.u32 31, %v760_v16  ;;  %v5148_v43 = vshrl.u32 %v760_v16, 5  ;;  %v671_v31 = vshrl.u32 %v6078_v57, %v5140_v10  ;;  %v674_v46 = vshrl.u32 %v6080_v1, %v5140_v10 }
 0x15d   : > { %v661_v16 = vshll.u32 %v6082_v47, %v658_v49  ;;  %v662_v4 = vshrl.u32 %v6086_v51, %v5140_v10  ;;  %vm678_vm14 = vcmp.lt.s32.totalorder %v5165_v36, 3  ;;  %vm677_vm1 = vcmp.lt.s32.totalorder %v5165_v36, 2 }
 0x15e   : > { %4237 = vmatmul.mubr.msk.f32.gmra.mrb[2].mxu1 %vm2209_vm2, %v5131_v24  ;;  %v5137_v5 = vsub.s32 32, %v762_v35  ;;  %v774_v19 = vshll.u32 %v6088_v55, %v762_v35  ;;  %v777_v14 = vshll.u32 %v6078_v57, %v762_v35  ;;  %v765_v28 = vshll.u32 %v6082_v47, %v762_v35 }
 0x15f   : > { %v768_v38 = vshll.u32 %v6086_v51, %v762_v35  ;;  %v771_v45 = vshll.u32 %v6102_v12, %v762_v35  ;;  %vm783_vm9 = vcmp.lt.s32.totalorder %v5148_v43, 4  ;;  %v664_v35 = vshll.u32 %v6086_v51, %v658_v49 }
 0x160   : > { %v775_v40 = vshrl.u32 %v6078_v57, %v5137_v5  ;;  %v778_v13 = vshrl.u32 %v6080_v1, %v5137_v5  ;;  %v766_v26 = vshrl.u32 %v6086_v51, %v5137_v5  ;;  %v769_v11 = vshrl.u32 %v6102_v12, %v5137_v5 }
 0x161   : > { %v772_v0 = vshrl.u32 %v6088_v55, %v5137_v5  ;;  %v675_v20 = vor.u32 %v674_v46, %v673_v41  ;;  %vm780_vm11 = vcmp.lt.s32.totalorder %v5148_v43, 1  ;;  %vm782_vm12 = vcmp.lt.s32.totalorder %v5148_v43, 3 }
 0x162   : > { %v776_v34 = vor.u32 %v775_v40, %v774_v19  ;;  %v779_v25 = vor.u32 %v778_v13, %v777_v14  ;;  %v665_v19 = vshrl.u32 %v6102_v12, %v5140_v10  ;;  %v668_v40 = vshrl.u32 %v6088_v55, %v5140_v10 }
 0x163   : > { %v767_v57 = vor.u32 %v766_v26, %v765_v28  ;;  %v651_v14 = vand.u32 8388607, %v6090_v18  ;;  %v672_v13 = vor.u32 %v671_v31, %v670_v44  ;;  %v770_v1 = vor.u32 %v769_v11, %v768_v38 }
 0x164   : > { %v773_v47 = vor.u32 %v772_v0, %v771_v45  ;;  %v789_v49 = vsel %vm783_vm9, %v776_v34, 920167782  ;;  %v793_v28 = vsel %vm783_vm9, %v779_v25, 1326507024  ;;  %v663_v26 = vor.u32 %v662_v4, %v661_v16 }
 0x165   : > { %v666_v51 = vor.u32 %v665_v19, %v664_v35  ;;  %v669_v55 = vor.u32 %v668_v40, %v667_v48  ;;  %v652_v44 = vor.u32 8388608, %v651_v14  ;;  %v685_v58 = vsel %vm679_vm10, %v672_v13, 920167782  ;;  %v5227_v14 = vld [vmem:[%s6071_s3 + $0x20] sm:$0xff] }
 0x166   : > { %vm781_vm15 = vcmp.lt.s32.totalorder %v5148_v43, 2  ;;  %v788_v38 = vsel %vm780_vm11, %v767_v57, %v770_v1  ;;  %v790_v11 = vsel %vm782_vm12, %v773_v47, %v789_v49  ;;  %v689_v4 = vsel %vm679_vm10, %v675_v20, 1326507024  ;;  %4247 = vmatprep.mubr.msk.f32.mxu1 %vm2209_vm2, %v5227_v14  ;;  %v300_v43 = vld [vmem:[%s6070_s2 + $0x30] sm:$0xff] }
 0x167   : > { %v792_v45 = vsel %vm780_vm11, %v770_v1, %v773_v47  ;;  %v794_v0 = vsel %vm782_vm12, %v776_v34, %v793_v28  ;;  %v796_v31 = vshll.u32 %v756_v2, 8  ;;  %v684_v41 = vsel %vm676_vm13, %v663_v26, %v666_v51  ;;  %4222 = vmatprep.mubr.msk.f32.mxu0 %vm302_vm0, %v300_v43 }
 0x168   : > { %v686_v46 = vsel %vm678_vm14, %v669_v55, %v685_v58  ;;  %v791_v25 = vsel %vm781_vm15, %v788_v38, %v790_v11  ;;  %v688_v20 = vsel %vm676_vm13, %v666_v51, %v669_v55  ;;  %v690_v16 = vsel %vm678_vm14, %v672_v13, %v689_v4 }
 0x169   : > { %v795_v2 = vsel %vm781_vm15, %v792_v45, %v794_v0  ;;  %v692_v34 = vshll.u32 %v652_v44, 8  ;;  %v687_v35 = vsel %vm677_vm1, %v684_v41, %v686_v46  ;;  %v691_v40 = vsel %vm677_vm1, %v688_v20, %v690_v16 }
 0x16a   : > { %v5219_v19 = vmul.u32.u64.low %v796_v31, %v791_v25  ;;  %v5220_v48 = vmul.u32.u64.high %v796_v31, %v791_v25, %v5219_v19  ;;  %v6103_v13 = vmov 683565275   ;;  %v785_v44 = vsel %vm783_vm9, %v773_v47, 2102212464 }
 0x16b   : > { %v764_v49 = vshrl.u32 %v6103_v13, %v5137_v5  ;;  %v5231_v28 = vmul.u32.u64.low %v796_v31, %v795_v2  ;;  %v5232_v58 = vmul.u32.u64.high %v796_v31, %v795_v2, %v5231_v28  ;;  %v660_v4 = vshrl.u32 %v6103_v13, %v5140_v10  ;;  %v301_v2 = vld [vmem:[%s6070_s2 + $0x38] sm:$0xff] }
 0x16c   : > { %v5238_v38 = vmul.u32.u64.low %v692_v34, %v687_v35  ;;  %v5239_v11 = vmul.u32.u64.high %v692_v34, %v687_v35, %v5238_v38  ;;  %v5243_v45 = vmul.u32.u64.low %v692_v34, %v691_v40  ;;  %v5244_v0 = vmul.u32.u64.high %v692_v34, %v691_v40, %v5243_v45  ;;  %4223 = vmatmul.mubr.msk.f32.gmra.mrb[6].mxu0 %vm302_vm0, %v301_v2  ;;  %v5274_v40 = vpop.f32.mrb[4].mxu0 }
 0x16d   : > { %v681_v5 = vsel %vm679_vm10, %v669_v55, 2102212464  ;;  %v784_v41 = vsel %vm780_vm11, %v764_v49, %v767_v57  ;;  %v786_v46 = vsel %vm782_vm12, %v770_v1, %v785_v44  ;;  %v680_v47 = vsel %vm676_vm13, %v660_v4, %v663_v26 }
 0x16e   : > { %v682_v25 = vsel %vm678_vm14, %v666_v51, %v681_v5  ;;  %v787_v10 = vsel %vm781_vm15, %v784_v41, %v786_v46  ;;  %v806_v20 = vadd.s32 1, %v5220_v48  ;;  %vm805_vm3 = vc.u32 %v5232_v58, %v5219_v19 }
 0x16f   : > { %v683_v55 = vsel %vm677_vm1, %v680_v47, %v682_v25  ;;  %v702_v57 = vadd.s32 1, %v5239_v11  ;;  %v803_v16 = vmul.u32 %v796_v31, %v787_v10  ;;  %vm701_vm4 = vc.u32 %v5244_v0, %v5238_v38 }
 0x170   : > { %v807_v1 = vsel %vm805_vm3, %v806_v20, %v5220_v48  ;;  %v699_v26 = vmul.u32 %v692_v34, %v683_v55  ;;  %v5276_v34 = vpop.f32.mrb[5].mxu0  ;;  %vm646_vm7 = vcmp.lt.s32.totalorder %v4936_v29, 0 }
 0x171   : > { %v703_v51 = vsel %vm701_vm4, %v702_v57, %v5239_v11  ;;  %v808_v36 = vadd.s32 %v807_v1, %v803_v16 }
 0x172   : > { %v704_v31 = vadd.s32 %v703_v51, %v699_v26  ;;  %v804_v51 = vadd.s32 %v5219_v19, %v5232_v58 }
 0x173   : > { %v809_v35 = vadd.s32 536870912, %v808_v36 }
 0x174   : > { %v705_v48 = vadd.s32 536870912, %v704_v31 }
 0x175   : > { %v810_v49 = vshrl.u32 %v809_v35, 30 }
 0x176   : > { %v706_v28 = vshrl.u32 %v705_v48, 30 }
 0x177   : > { %v811_v44 = vshll.u32 %v810_v49, 30 }
 0x178   : > { %v707_v11 = vshll.u32 %v706_v28, 30 }
 0x179   : > { %v812_v4 = vsub.s32 %v808_v36, %v811_v44  ;;  %v700_v36 = vadd.s32 %v5238_v38, %v5244_v0  ;;  %v6104_v0 = vand.u32 2147483647, %v4934_v27 }
 0x17a   : > { %v708_v45 = vsub.s32 %v704_v31, %v707_v11 }
 0x17b   : > { %v814_v5 = vsub.s32 0, %v812_v4  ;;  %vm749_vm8 = vcmp.le.f32.partialorder %v6104_v0, 0.7853982 }
 0x17c   : > { %v710_v41 = vsub.s32 0, %v708_v45 }
 0x17d   : > { %v3970_v46 = vmin.u32 %v814_v5, %v812_v4 }
 0x17e   : > { %v3966_v47 = vmin.u32 %v710_v41, %v708_v45 }
 0x17f   : > { %v816_v25 = vclz %v3970_v46 }
 0x180   : > { %v712_v10 = vclz %v3966_v47 }
 0x181   : > { %v3971_v20 = vadd.s32 4294967294, %v816_v25 }
 0x182   : > { %v3967_v55 = vadd.s32 4294967294, %v712_v10 }
 0x183   : > { %vm3972_vm0 = vcmp.lt.s32.totalorder %v3971_v20, 0 }
 0x184   : > { %vm3968_vm5 = vcmp.lt.s32.totalorder %v3967_v55, 0  ;;  %v819_v57 = vsel %vm3972_vm0, 0, %v3971_v20 }
 0x185   : > { %v715_v16 = vsel %vm3968_vm5, 0, %v3967_v55  ;;  %v824_v1 = vsub.s32 4294967266, %v819_v57  ;;  %v820_v43 = vsub.s32 32, %v819_v57  ;;  %v821_v48 = vshll.u32 %v812_v4, %v819_v57 }
 0x186   : > { %v720_v26 = vsub.s32 4294967266, %v715_v16  ;;  %v716_v31 = vsub.s32 32, %v715_v16  ;;  %v717_v5 = vshll.u32 %v708_v45, %v715_v16  ;;  %v6105_v45 = vand.u32 2147483647, %v4936_v29 }
 0x187   : > { %v825_v2 = vadd.s32 127, %v824_v1  ;;  %v822_v44 = vshrl.u32 %v804_v51, %v820_v43  ;;  %v730_v51 = vsub.s32 4, %v706_v28  ;;  %vm840_vm5 = vweird.f32 %v4934_v27 }
 0x188   : > { %v721_v35 = vadd.s32 127, %v720_v26  ;;  %v718_v41 = vshrl.u32 %v700_v36, %v716_v31  ;;  %vm645_vm9 = vcmp.le.f32.partialorder %v6105_v45, 0.7853982  ;;  %v834_v26 = vsub.s32 4, %v810_v49 }
 0x189   : > { %v826_v11 = vshll.u32 %v825_v2, 23  ;;  %v823_v47 = vor.u32 %v822_v44, %v821_v48  ;;  %v731_v43 = vsel %vm646_vm7, %v730_v51, %v706_v28 }
 0x18a   : > { %v722_v46 = vshll.u32 %v721_v35, 23  ;;  %v719_v10 = vor.u32 %v718_v41, %v717_v5  ;;  %v733_v36 = vsel %vm645_vm9, 0, %v731_v43 }
 0x18b   : > { %v827_v25 = vor.u32 4788187, %v826_v11  ;;  %v830_v18 = vcvt.s32.f32 %v823_v47 }
 0x18c   : > { %v723_v20 = vor.u32 4788187, %v722_v46  ;;  %v726_v19 = vcvt.s32.f32 %v719_v10 }
 0x18d   : > { %v828_v55 = vand.u32 2147483647, %v827_v25 }
 0x18e   : > { %v724_v56 = vand.u32 2147483647, %v723_v20  ;;  %v1567_v20 = vand.u32 3, %v733_v36 }
 0x18f   : > { %v831_v58 = vmul.f32 %v830_v18, %v828_v55  ;;  %v835_v18 = vsel %vm750_vm6, %v834_v26, %v810_v49 }
 0x190   : > { %v727_v1 = vmul.f32 %v726_v19, %v724_v56  ;;  %v837_v2 = vsel %vm749_vm8, 0, %v835_v18  ;;  %vm1569_vm4 = vcmp.eq.s32.totalorder %v1567_v20, 0  ;;  %vm1572_vm0 = vcmp.eq.s32.totalorder %v1567_v20, 2 }
 0x191   : > { %v832_v33 = vxor.u32 2147483648, %v831_v58  ;;  %v841_v31 = vadd.s32 3, %v837_v2  ;;  %v1670_v46 = vand.u32 3, %v837_v2 }
 0x192   : > { %v728_v38 = vxor.u32 2147483648, %v727_v1 }
 0x193   : > { %v833_v4 = vsel %vm750_vm6, %v832_v33, %v831_v58  ;;  %v737_v33 = vadd.s32 3, %v733_v36  ;;  %v842_v11 = vand.u32 3, %v841_v31  ;;  %vm1672_vm15 = vcmp.eq.s32.totalorder %v1670_v46, 0 }
 0x194   : > { %v729_v57 = vsel %vm646_vm7, %v728_v38, %v727_v1  ;;  %v836_v16 = vsel %vm749_vm8, %v4934_v27, %v833_v4  ;;  %vm1675_vm3 = vcmp.eq.s32.totalorder %v1670_v46, 2  ;;  %vm1671_vm6 = vcmp.lt.s32.totalorder %v1670_v46, 2  ;;  %v5323_v27 = vld [vmem:[%s6071_s3 + $0x30] sm:$0xff] }
 0x195   : > { %v732_v56 = vsel %vm645_vm9, %v4936_v29, %v729_v57  ;;  %4597 = vcosq.f32 %v836_v16  ;;  %v738_v41 = vand.u32 3, %v737_v33  ;;  %vm844_vm10 = vcmp.eq.s32.totalorder %v842_v11, 0 }
 0x196   : > { %4599 = vsinq.f32 %v836_v16  ;;  %vm847_vm11 = vcmp.eq.s32.totalorder %v842_v11, 2  ;;  %vm843_vm14 = vcmp.lt.s32.totalorder %v842_v11, 2  ;;  %vm736_vm7 = vweird.f32 %v4936_v29  ;;  %v5333_v29 = vld [vmem:[%s6071_s3 + $0x38] sm:$0xff] }
 0x197   : > { %4601 = vcosq.f32 %v732_v56  ;;  %vm740_vm12 = vcmp.eq.s32.totalorder %v738_v41, 0  ;;  %vm743_vm13 = vcmp.eq.s32.totalorder %v738_v41, 2  ;;  %vm739_vm1 = vcmp.lt.s32.totalorder %v738_v41, 2 }
 0x198   : > { %4603 = vsinq.f32 %v732_v56  ;;  %vm1568_vm8 = vcmp.lt.s32.totalorder %v1567_v20, 2 }
 0x19f   : > { %v4598_v35 = vpop.eup %4597 }
 0x1a0   : > { %v4600_v48 = vpop.eup %4599  ;;  %v848_v25 = vxor.u32 2147483648, %v4598_v35 }
 0x1a1   : > { %v4602_v44 = vpop.eup %4601  ;;  %v845_v47 = vxor.u32 2147483648, %v4600_v48 }
 0x1a2   : > { %v4604_v5 = vpop.eup %4603  ;;  %v744_v49 = vxor.u32 2147483648, %v4602_v44  ;;  %v849_v55 = vsel %vm847_vm11, %v848_v25, %v4600_v48  ;;  %v1677_v45 = vsel %vm1675_vm3, %v848_v25, %v4600_v48  ;;  %v855_v25 = vand.u32 2139095040, %v5276_v34 }
 0x1a3   : > { %v741_v10 = vxor.u32 2147483648, %v4604_v5  ;;  %v846_v28 = vsel %vm844_vm10, %v4598_v35, %v845_v47  ;;  %v1674_v4 = vsel %vm1672_vm15, %v4598_v35, %v845_v47 }
 0x1a4   : > { %v745_v58 = vsel %vm743_vm13, %v744_v49, %v4604_v5  ;;  %v850_v1 = vsel %vm843_vm14, %v846_v28, %v849_v55  ;;  %v1574_v51 = vsel %vm1572_vm0, %v744_v49, %v4604_v5  ;;  %v1678_v36 = vsel %vm1671_vm6, %v1674_v4, %v1677_v45 }
 0x1a5   : > { %v742_v19 = vsel %vm740_vm12, %v4602_v44, %v741_v10  ;;  %v1571_v26 = vsel %vm1569_vm4, %v4602_v44, %v741_v10  ;;  %v5293_v56 = vsel %vm840_vm5, nan, %v850_v1  ;;  %v5305_v44 = vsel %vm840_vm5, nan, %v1678_v36 }
 0x1a6   : > { %v746_v0 = vsel %vm739_vm1, %v742_v19, %v745_v58  ;;  %v1575_v33 = vsel %vm1568_vm8, %v1571_v26, %v1574_v51  ;;  %v856_v10 = vshrl.u32 %v855_v25, 23  ;;  %v6092_v45 = vand.u32 2147483647, %v5276_v34 }
 0x1a7   : > { %v5299_v2 = vsel %vm736_vm7, nan, %v746_v0  ;;  %v5311_v41 = vsel %vm736_vm7, nan, %v1575_v33  ;;  %v6107_v26 = vmov 920167782   ;;  %vm958_vm8 = vcmp.lt.s32.totalorder %v5274_v40, 0 }
 0x1a8   : > { %v3973_v20 = vadd.s32 4294967169, %v856_v10 }
 0x1aa   : > { %v862_v55 = vadd.s32 1, %v3973_v20 }
 0x1ac   : > { %vm863_vm10 = vcmp.gt.s32.totalorder %v862_v55, 0 }
 0x22d   : > { %v4235_v38 = vpop.f32.mrb[0].mxu1 }
 0x22e   : > { %v2294_v57 = vadd.f32 %v4235_v38, %v4918_v15  ;;  %v2288_v16 = vpop.f32.mrb[1].mxu1 }
 0x22f   : > { %v2289_v18 = vadd.f32 %v2288_v16, %v4922_v17 }
 0x230   : > { %v2308_v43 = vmul.f32 %v2294_v57, %v5293_v56  ;;  %v6106_v57 = vmov 2102212464  }
 0x231   : > { %v2307_v31 = vmul.f32 %v2289_v18, %v5299_v2  ;;  %v4238_v15 = vpop.f32.mrb[2].mxu1 }
 0x232   : > { %v2304_v35 = vadd.f32 %v4238_v15, %v4929_v23  ;;  %v2298_v48 = vpop.f32.mrb[3].mxu1  ;;  %v5317_v23 = vld [vmem:[%s6071_s3 + $0x28] sm:$0xff]  ;;  %v6109_v15 = vmov 2475754826  }
 0x233   : > { %v2299_v17 = vadd.f32 %v2298_v48, %v4941_v32  ;;  %v4401_v11 = vpack.c.bf16 %v2308_v43, %v2307_v31  ;;  %v4621_v32 = vld [vmem:[%s6071_s3] sm:$0xff]  ;;  %v6108_v43 = vmov 1326507024  }
 0x234   : > { %v2310_v5 = vmul.f32 %v2304_v35, %v5305_v44 }
 0x235   : > { %v2309_v46 = vmul.f32 %v2299_v17, %v5311_v41  ;;  %4402 = vmatprep.subr.bf16.mxu1 %v4401_v11 }
 0x236   : > { %4404 = vmatpush3.bf16.msra.mxu1 %v4401_v11 }
 0x237   : > { %v4405_v47 = vpack.c.bf16 %v2310_v5, %v2309_v46 }
 0x239   : > { %4406 = vmatprep.subr.bf16.mxu1 %v4405_v47 }
 0x23a   : > { %4408 = vmatpush3.bf16.msra.mxu1 %v4405_v47 }
 0x23b   : > { %4418 = vmatprep.subr.bf16.mxu1 %v5103_v54 }
 0x23d   : > { %4248 = vmatmul.mubr.msk.f32.vlgmr.msra.gmra.mrb[4].mxu1 %vm2209_vm2, %v5317_v23 }
 0x23e   : > { %4420 = vmatpush3.bf16.msra.mxu1 %v5103_v54  ;;  %4250 = vmatprep.mubr.msk.f32.mxu1 %vm2209_vm2, %v5323_v27  ;;  %v959_v54 = vand.u32 2139095040, %v5274_v40 }
 0x23f   : > { %4422 = vmatprep.subr.bf16.mxu1 %v5108_v62 }
 0x241   : > { %4251 = vmatmul.mubr.msk.f32.gmra.mrb[6].mxu1 %vm2209_vm2, %v5333_v29 }
 0x242   : > { %4424 = vmatpush3.bf16.msra.mxu1 %v5108_v62  ;;  %4275 = vmatprep.mubr.msk.f32.mxu1 %vm2209_vm2, %v4621_v32  ;;  %v960_v62 = vshrl.u32 %v959_v54, 23 }
 0x244   : > { %v3977_v49 = vadd.s32 4294967169, %v960_v62 }
 0x245   : > { %4276 = vmatmul.mubr.msk.f32.vlgmr.msra.gmra.mrb[8].mxu1 %vm2209_vm2, %v5117_v39  ;;  %v864_v39 = vsel %vm863_vm10, %v862_v55, 0 }
 0x246   : > { %4278 = vmatprep.mubr.msk.f32.mxu1 %vm2209_vm2, %v5122_v9  ;;  %v966_v28 = vadd.s32 1, %v3977_v49  ;;  %v866_v1 = vand.u32 31, %v864_v39  ;;  %v6091_v9 = vand.u32 2147483647, %v5274_v40  ;;  %v5370_v48 = vshrl.u32 %v864_v39, 5 }
 0x248   : > { %vm967_vm9 = vcmp.gt.s32.totalorder %v966_v28, 0  ;;  %v963_v0 = vand.u32 8388607, %v6091_v9  ;;  %v878_v5 = vshll.u32 %v6106_v57, %v866_v1  ;;  %v881_v32 = vshll.u32 %v6107_v26, %v866_v1 }
 0x249   : > { %4279 = vmatmul.mubr.msk.f32.gmra.mrb[10].mxu1 %vm2209_vm2, %v5131_v24  ;;  %v968_v19 = vsel %vm967_vm9, %v966_v28, 0  ;;  %v5354_v24 = vsub.s32 32, %v866_v1  ;;  %v869_v10 = vshll.u32 %v6103_v13, %v866_v1  ;;  %v872_v49 = vshll.u32 %v6109_v15, %v866_v1 }
 0x24a   : > { %v970_v58 = vand.u32 31, %v968_v19  ;;  %v5358_v4 = vshrl.u32 %v968_v19, 5  ;;  %v875_v55 = vshll.u32 %v6102_v12, %v866_v1  ;;  %vm887_vm12 = vcmp.lt.s32.totalorder %v5370_v48, 4 }
 0x24b   : > { %v879_v46 = vshrl.u32 %v6107_v26, %v5354_v24  ;;  %v882_v54 = vshrl.u32 %v6108_v43, %v5354_v24  ;;  %v870_v20 = vshrl.u32 %v6109_v15, %v5354_v24  ;;  %v873_v28 = vshrl.u32 %v6102_v12, %v5354_v24 }
 0x24c   : > { %v5352_v38 = vsub.s32 32, %v970_v58  ;;  %v982_v16 = vshll.u32 %v6106_v57, %v970_v58  ;;  %v985_v18 = vshll.u32 %v6107_v26, %v970_v58  ;;  %v973_v31 = vshll.u32 %v6103_v13, %v970_v58 }
 0x24d   : > { %v976_v33 = vshll.u32 %v6109_v15, %v970_v58  ;;  %v979_v35 = vshll.u32 %v6102_v12, %v970_v58  ;;  %vm991_vm11 = vcmp.lt.s32.totalorder %v5358_v4, 4  ;;  %v876_v19 = vshrl.u32 %v6106_v57, %v5354_v24 }
 0x24e   : > { %v983_v51 = vshrl.u32 %v6107_v26, %v5352_v38  ;;  %v986_v36 = vshrl.u32 %v6108_v43, %v5352_v38  ;;  %v974_v17 = vshrl.u32 %v6109_v15, %v5352_v38  ;;  %v977_v11 = vshrl.u32 %v6102_v12, %v5352_v38 }
 0x24f   : > { %v980_v47 = vshrl.u32 %v6106_v57, %v5352_v38  ;;  %v859_v58 = vand.u32 8388607, %v6092_v45  ;;  %v964_v9 = vor.u32 8388608, %v963_v0  ;;  %vm988_vm13 = vcmp.lt.s32.totalorder %v5358_v4, 1 }
 0x250   : > { %v984_v25 = vor.u32 %v983_v51, %v982_v16  ;;  %v987_v62 = vor.u32 %v986_v36, %v985_v18  ;;  %v975_v39 = vor.u32 %v974_v17, %v973_v31  ;;  %v880_v16 = vor.u32 %v879_v46, %v878_v5 }
 0x251   : > { %v978_v51 = vor.u32 %v977_v11, %v976_v33  ;;  %v981_v18 = vor.u32 %v980_v47, %v979_v35  ;;  %v883_v36 = vor.u32 %v882_v54, %v881_v32  ;;  %vm990_vm14 = vcmp.lt.s32.totalorder %v5358_v4, 3 }
 0x252   : > { %v997_v1 = vsel %vm991_vm11, %v984_v25, 920167782  ;;  %v1001_v31 = vsel %vm991_vm11, %v987_v62, 1326507024  ;;  %v871_v17 = vor.u32 %v870_v20, %v869_v10  ;;  %v874_v61 = vor.u32 %v873_v28, %v872_v49 }
 0x253   : > { %v877_v45 = vor.u32 %v876_v19, %v875_v55  ;;  %v860_v5 = vor.u32 8388608, %v859_v58  ;;  %vm884_vm15 = vcmp.lt.s32.totalorder %v5370_v48, 1  ;;  %vm886_vm1 = vcmp.lt.s32.totalorder %v5370_v48, 3 }
 0x254   : > { %v893_v0 = vsel %vm887_vm12, %v880_v16, 920167782  ;;  %vm989_vm3 = vcmp.lt.s32.totalorder %v5358_v4, 2  ;;  %v996_v33 = vsel %vm988_vm13, %v975_v39, %v978_v51  ;;  %v998_v35 = vsel %vm990_vm14, %v981_v18, %v997_v1 }
 0x255   : > { %v897_v11 = vsel %vm887_vm12, %v883_v36, 1326507024  ;;  %v1000_v46 = vsel %vm988_vm13, %v978_v51, %v981_v18  ;;  %v1002_v47 = vsel %vm990_vm14, %v984_v25, %v1001_v31  ;;  %v1004_v32 = vshll.u32 %v964_v9, 8 }
 0x256   : > { %vm885_vm4 = vcmp.lt.s32.totalorder %v5370_v48, 2  ;;  %v892_v54 = vsel %vm884_vm15, %v871_v17, %v874_v61  ;;  %v894_v62 = vsel %vm886_vm1, %v877_v45, %v893_v0  ;;  %v999_v10 = vsel %vm989_vm3, %v996_v33, %v998_v35  ;;  %v5451_v33 = vld [vmem:[%s6071_s3 + $0x40] sm:$0xff] }
 0x257   : > { %v896_v49 = vsel %vm884_vm15, %v874_v61, %v877_v45  ;;  %v898_v20 = vsel %vm886_vm1, %v880_v16, %v897_v11  ;;  %v1003_v9 = vsel %vm989_vm3, %v1000_v46, %v1002_v47  ;;  %v900_v25 = vshll.u32 %v860_v5, 8  ;;  %4261 = vmatprep.mubr.msk.f32.mxu0 %vm2209_vm2, %v5451_v33  ;;  %4303 = vmatprep.mubr.msk.f32.mxu1 %vm2209_vm2, %v5451_v33 }
 0x258   : > { %v895_v28 = vsel %vm885_vm4, %v892_v54, %v894_v62  ;;  %v5433_v55 = vmul.u32.u64.low %v1004_v32, %v999_v10  ;;  %v5434_v19 = vmul.u32.u64.high %v1004_v32, %v999_v10, %v5433_v55  ;;  %v899_v58 = vsel %vm885_vm4, %v896_v49, %v898_v20 }
 0x259   : > { %v972_v36 = vshrl.u32 %v6103_v13, %v5352_v38  ;;  %v5440_v1 = vmul.u32.u64.low %v1004_v32, %v1003_v9  ;;  %v5441_v31 = vmul.u32.u64.high %v1004_v32, %v1003_v9, %v5440_v1  ;;  %v993_v16 = vsel %vm991_vm11, %v981_v18, 2102212464 }
 0x25a   : > { %v5445_v0 = vmul.u32.u64.low %v900_v25, %v895_v28  ;;  %v5446_v5 = vmul.u32.u64.high %v900_v25, %v895_v28, %v5445_v0  ;;  %v868_v35 = vshrl.u32 %v6103_v13, %v5354_v24  ;;  %v889_v38 = vsel %vm887_vm12, %v877_v45, 2102212464 }
 0x25b   : > { %v5455_v11 = vmul.u32.u64.low %v900_v25, %v899_v58  ;;  %v5456_v46 = vmul.u32.u64.high %v900_v25, %v899_v58, %v5455_v11  ;;  %v992_v18 = vsel %vm988_vm13, %v972_v36, %v975_v39  ;;  %v994_v47 = vsel %vm990_vm14, %v978_v51, %v993_v16  ;;  %v5482_v58 = vpop.f32.mrb[6].mxu0 }
 0x25c   : > { %v888_v24 = vsel %vm884_vm15, %v868_v35, %v871_v17  ;;  %v890_v54 = vsel %vm886_vm1, %v874_v61, %v889_v38  ;;  %v995_v62 = vsel %vm989_vm3, %v992_v18, %v994_v47  ;;  %v1014_v10 = vadd.s32 1, %v5434_v19  ;;  %v5484_v1 = vpop.f32.mrb[7].mxu0 }
 0x25d   : > { %vm1013_vm0 = vc.u32 %v5441_v31, %v5433_v55  ;;  %v891_v45 = vsel %vm885_vm4, %v888_v24, %v890_v54  ;;  %v910_v39 = vadd.s32 1, %v5446_v5  ;;  %v1011_v49 = vmul.u32 %v1004_v32, %v995_v62 }
 0x25e   : > { %vm909_vm5 = vc.u32 %v5456_v46, %v5445_v0  ;;  %v1015_v51 = vsel %vm1013_vm0, %v1014_v10, %v5434_v19  ;;  %v907_v17 = vmul.u32 %v900_v25, %v891_v45  ;;  %vm854_vm9 = vcmp.lt.s32.totalorder %v5276_v34, 0 }
 0x25f   : > { %v911_v61 = vsel %vm909_vm5, %v910_v39, %v5446_v5  ;;  %v1016_v20 = vadd.s32 %v1015_v51, %v1011_v49  ;;  %v1012_v49 = vadd.s32 %v5433_v55, %v5441_v31 }
 0x260   : > { %v912_v4 = vadd.s32 %v911_v61, %v907_v17  ;;  %v908_v61 = vadd.s32 %v5445_v0, %v5456_v46  ;;  %v6110_v46 = vand.u32 2147483647, %v5274_v40 }
 0x261   : > { %v1017_v9 = vadd.s32 536870912, %v1016_v20 }
 0x262   : > { %v913_v28 = vadd.s32 536870912, %v912_v4  ;;  %vm957_vm10 = vcmp.le.f32.partialorder %v6110_v46, 0.7853982 }
 0x263   : > { %v1018_v36 = vshrl.u32 %v1017_v9, 30 }
 0x264   : > { %v914_v48 = vshrl.u32 %v913_v28, 30 }
 0x265   : > { %v1019_v16 = vshll.u32 %v1018_v36, 30 }
 0x266   : > { %v915_v35 = vshll.u32 %v914_v48, 30 }
 0x267   : > { %v1020_v32 = vsub.s32 %v1016_v20, %v1019_v16 }
 0x268   : > { %v916_v11 = vsub.s32 %v912_v4, %v915_v35 }
 0x269   : > { %v1022_v38 = vsub.s32 0, %v1020_v32 }
 0x26a   : > { %v918_v18 = vsub.s32 0, %v916_v11 }
 0x26b   : > { %v3978_v19 = vmin.u32 %v1022_v38, %v1020_v32 }
 0x26c   : > { %v3974_v25 = vmin.u32 %v918_v18, %v916_v11 }
 0x26d   : > { %v1024_v47 = vclz %v3978_v19 }
 0x26e   : > { %v920_v5 = vclz %v3974_v25 }
 0x26f   : > { %v3979_v24 = vadd.s32 4294967294, %v1024_v47 }
 0x270   : > { %v3975_v54 = vadd.s32 4294967294, %v920_v5 }
 0x271   : > { %vm3980_vm6 = vcmp.lt.s32.totalorder %v3979_v24, 0 }
 0x272   : > { %vm3976_vm7 = vcmp.lt.s32.totalorder %v3975_v54, 0  ;;  %v1027_v62 = vsel %vm3980_vm6, 0, %v3979_v24 }
 0x273   : > { %v923_v10 = vsel %vm3976_vm7, 0, %v3975_v54  ;;  %v1032_v45 = vsub.s32 4294967266, %v1027_v62  ;;  %v1028_v51 = vsub.s32 32, %v1027_v62  ;;  %v1029_v9 = vshll.u32 %v1020_v32, %v1027_v62 }
 0x274   : > { %v928_v39 = vsub.s32 4294967266, %v923_v10  ;;  %v924_v20 = vsub.s32 32, %v923_v10  ;;  %v925_v35 = vshll.u32 %v916_v11, %v923_v10  ;;  %v6111_v11 = vand.u32 2147483647, %v5276_v34 }
 0x275   : > { %v1033_v17 = vadd.s32 127, %v1032_v45  ;;  %v1030_v28 = vshrl.u32 %v1012_v49, %v1028_v51  ;;  %v938_v49 = vsub.s32 4, %v914_v48  ;;  %vm1048_vm7 = vweird.f32 %v5274_v40 }
 0x276   : > { %v929_v4 = vadd.s32 127, %v928_v39  ;;  %v926_v38 = vshrl.u32 %v908_v61, %v924_v20  ;;  %vm853_vm11 = vcmp.le.f32.partialorder %v6111_v11, 0.7853982  ;;  %v1042_v39 = vsub.s32 4, %v1018_v36 }
 0x277   : > { %v1034_v16 = vshll.u32 %v1033_v17, 23  ;;  %v1031_v19 = vor.u32 %v1030_v28, %v1029_v9  ;;  %v939_v17 = vsel %vm854_vm9, %v938_v49, %v914_v48 }
 0x278   : > { %v930_v18 = vshll.u32 %v929_v4, 23  ;;  %v927_v47 = vor.u32 %v926_v38, %v925_v35  ;;  %v1043_v51 = vsel %vm958_vm8, %v1042_v39, %v1018_v36  ;;  %v941_v20 = vsel %vm853_vm11, 0, %v939_v17 }
 0x279   : > { %v1035_v25 = vor.u32 4788187, %v1034_v16  ;;  %v1038_v54 = vcvt.s32.f32 %v1031_v19  ;;  %v1045_v61 = vsel %vm957_vm10, 0, %v1043_v51 }
 0x27a   : > { %v931_v5 = vor.u32 4788187, %v930_v18  ;;  %v934_v55 = vcvt.s32.f32 %v927_v47  ;;  %v1049_v4 = vadd.s32 3, %v1045_v61  ;;  %v1876_v19 = vand.u32 3, %v1045_v61 }
 0x27b   : > { %v1036_v24 = vand.u32 2147483647, %v1035_v25 }
 0x27c   : > { %v932_v52 = vand.u32 2147483647, %v931_v5  ;;  %v1050_v35 = vand.u32 3, %v1049_v4  ;;  %vm1878_vm3 = vcmp.eq.s32.totalorder %v1876_v19, 0  ;;  %vm1881_vm0 = vcmp.eq.s32.totalorder %v1876_v19, 2 }
 0x27d   : > { %v1039_v31 = vmul.f32 %v1038_v54, %v1036_v24  ;;  %v1773_v24 = vand.u32 3, %v941_v20 }
 0x27e   : > { %v935_v45 = vmul.f32 %v934_v55, %v932_v52  ;;  %vm1052_vm12 = vcmp.eq.s32.totalorder %v1050_v35, 0  ;;  %vm1055_vm13 = vcmp.eq.s32.totalorder %v1050_v35, 2  ;;  %vm1051_vm1 = vcmp.lt.s32.totalorder %v1050_v35, 2 }
 0x27f   : > { %v1040_v6 = vxor.u32 2147483648, %v1039_v31  ;;  %vm1775_vm5 = vcmp.eq.s32.totalorder %v1773_v24, 0  ;;  %vm1778_vm6 = vcmp.eq.s32.totalorder %v1773_v24, 2 }
 0x280   : > { %v936_v0 = vxor.u32 2147483648, %v935_v45 }
 0x281   : > { %v1041_v32 = vsel %vm958_vm8, %v1040_v6, %v1039_v31  ;;  %v945_v6 = vadd.s32 3, %v941_v20  ;;  %vm1877_vm8 = vcmp.lt.s32.totalorder %v1876_v19, 2 }
 0x282   : > { %v937_v62 = vsel %vm854_vm9, %v936_v0, %v935_v45  ;;  %v1044_v10 = vsel %vm957_vm10, %v5274_v40, %v1041_v32  ;;  %vm944_vm9 = vweird.f32 %v5276_v34  ;;  %vm1774_vm10 = vcmp.lt.s32.totalorder %v1773_v24, 2 }
 0x283   : > { %v940_v52 = vsel %vm853_vm11, %v5276_v34, %v937_v62  ;;  %4605 = vcosq.f32 %v1044_v10  ;;  %v946_v18 = vand.u32 3, %v945_v6 }
 0x284   : > { %4607 = vsinq.f32 %v1044_v10 }
 0x285   : > { %4609 = vcosq.f32 %v940_v52  ;;  %vm948_vm14 = vcmp.eq.s32.totalorder %v946_v18, 0  ;;  %vm951_vm15 = vcmp.eq.s32.totalorder %v946_v18, 2  ;;  %vm947_vm4 = vcmp.lt.s32.totalorder %v946_v18, 2 }
 0x286   : > { %4611 = vsinq.f32 %v940_v52 }
 0x28d   : > { %v4606_v9 = vpop.eup %4605 }
 0x28e   : > { %v4608_v28 = vpop.eup %4607  ;;  %v1056_v47 = vxor.u32 2147483648, %v4606_v9 }
 0x28f   : > { %v4610_v16 = vpop.eup %4609  ;;  %v1053_v25 = vxor.u32 2147483648, %v4608_v28 }
 0x290   : > { %v4612_v38 = vpop.eup %4611  ;;  %v952_v36 = vxor.u32 2147483648, %v4610_v16  ;;  %v1057_v54 = vsel %vm1055_vm13, %v1056_v47, %v4608_v28  ;;  %v1883_v11 = vsel %vm1881_vm0, %v1056_v47, %v4608_v28 }
 0x291   : > { %v949_v5 = vxor.u32 2147483648, %v4612_v38  ;;  %v1054_v48 = vsel %vm1052_vm12, %v4606_v9, %v1053_v25  ;;  %v1880_v32 = vsel %vm1878_vm3, %v4606_v9, %v1053_v25 }
 0x292   : > { %v953_v31 = vsel %vm951_vm15, %v952_v36, %v4612_v38  ;;  %v1058_v45 = vsel %vm1051_vm1, %v1054_v48, %v1057_v54  ;;  %v1780_v49 = vsel %vm1778_vm6, %v952_v36, %v4612_v38  ;;  %v1884_v20 = vsel %vm1877_vm8, %v1880_v32, %v1883_v11  ;;  %v5530_v54 = vld [vmem:[%s6071_s3 + $0x48] sm:$0xff] }
 0x293   : > { %v950_v55 = vsel %vm948_vm14, %v4610_v16, %v949_v5  ;;  %v1777_v39 = vsel %vm1775_vm5, %v4610_v16, %v949_v5  ;;  %v5501_v52 = vsel %vm1048_vm7, nan, %v1058_v45  ;;  %v5513_v16 = vsel %vm1048_vm7, nan, %v1884_v20 }
 0x294   : > { %v954_v46 = vsel %vm947_vm4, %v950_v55, %v953_v31  ;;  %v1781_v6 = vsel %vm1774_vm10, %v1777_v39, %v1780_v49  ;;  %v1164_v20 = vand.u32 2147483647, %v5482_v58  ;;  %vm1166_vm10 = vcmp.lt.s32.totalorder %v5482_v58, 0 }
 0x295   : > { %v5507_v61 = vsel %vm944_vm9, nan, %v954_v46  ;;  %v5519_v18 = vsel %vm944_vm9, nan, %v1781_v6 }
 0x310   : > { %v4249_v0 = vpop.f32.mrb[4].mxu1 }
 0x311   : > { %v2420_v62 = vadd.f32 %v4249_v0, %v4982_v37  ;;  %v2414_v10 = vpop.f32.mrb[5].mxu1  ;;  %v5563_v0 = vld [vmem:[%s6071_s3] sm:$0xff] }
 0x312   : > { %v2415_v51 = vadd.f32 %v2414_v10, %v4999_v63 }
 0x313   : > { %v2434_v17 = vmul.f32 %v2420_v62, %v5501_v52 }
 0x314   : > { %v2433_v4 = vmul.f32 %v2415_v51, %v5507_v61  ;;  %v4252_v37 = vpop.f32.mrb[6].mxu1 }
 0x315   : > { %v2430_v9 = vadd.f32 %v4252_v37, %v5013_v21  ;;  %v2424_v28 = vpop.f32.mrb[7].mxu1  ;;  %v1171_v37 = vand.u32 8388607, %v1164_v20 }
 0x316   : > { %v2425_v63 = vadd.f32 %v2424_v28, %v5019_v30  ;;  %v4409_v35 = vpack.c.bf16 %v2434_v17, %v2433_v4 }
 0x317   : > { %v2436_v38 = vmul.f32 %v2430_v9, %v5513_v16  ;;  %v1060_v9 = vand.u32 2147483647, %v5484_v1 }
 0x318   : > { %v2435_v19 = vmul.f32 %v2425_v63, %v5519_v18  ;;  %4410 = vmatprep.subr.bf16.mxu0 %v4409_v35  ;;  %v4277_v25 = vpop.f32.mrb[8].mxu1 }
 0x319   : > { %v2731_v21 = vadd.f32 %v4277_v25, %v5027_v60  ;;  %4412 = vmatpush3.bf16.msra.mxu0 %v4409_v35  ;;  %v2725_v47 = vpop.f32.mrb[9].mxu1 }
 0x31a   : > { %v2726_v40 = vadd.f32 %v2725_v47, %v5033_v59  ;;  %v4413_v5 = vpack.c.bf16 %v2436_v38, %v2435_v19  ;;  %v5536_v59 = vld [vmem:[%s6071_s3 + $0x50] sm:$0xff] }
 0x31b   : > { %v2745_v30 = vmul.f32 %v2731_v21, %v5293_v56 }
 0x31c   : > { %v2744_v36 = vmul.f32 %v2726_v40, %v5299_v2  ;;  %4414 = vmatprep.subr.bf16.mxu0 %v4413_v5  ;;  %v4280_v24 = vpop.f32.mrb[10].mxu1 }
 0x31d   : > { %v2741_v34 = vadd.f32 %v4280_v24, %v5037_v7  ;;  %4416 = vmatpush3.bf16.msra.mxu0 %v4413_v5  ;;  %v2735_v48 = vpop.f32.mrb[11].mxu1  ;;  %v5547_v7 = vld [vmem:[%s6071_s3 + $0x58] sm:$0xff] }
 0x31e   : > { %v2736_v60 = vadd.f32 %v2735_v48, %v5039_v22  ;;  %v4425_v55 = vpack.c.bf16 %v2745_v30, %v2744_v36 }
 0x31f   : > { %v2747_v31 = vmul.f32 %v2741_v34, %v5305_v44 }
 0x320   : > { %v2746_v45 = vmul.f32 %v2736_v60, %v5311_v41  ;;  %4262 = vmatmul.mubr.msk.f32.vlgmr.msra.gmra.mrb[8].mxu0 %vm2209_vm2, %v5530_v54  ;;  %4426 = vmatprep.subr.bf16.mxu0 %v4425_v55 }
 0x321   : > { %4428 = vmatpush3.bf16.msra.mxu0 %v4425_v55  ;;  %4264 = vmatprep.mubr.msk.f32.mxu0 %vm2209_vm2, %v5536_v59 }
 0x322   : > { %v4429_v22 = vpack.c.bf16 %v2747_v31, %v2746_v45 }
 0x324   : > { %4265 = vmatmul.mubr.msk.f32.gmra.mrb[10].mxu0 %vm2209_vm2, %v5547_v7  ;;  %4430 = vmatprep.subr.bf16.mxu0 %v4429_v22 }
 0x325   : > { %4432 = vmatpush3.bf16.msra.mxu0 %v4429_v22  ;;  %4289 = vmatprep.mubr.msk.f32.mxu0 %vm2209_vm2, %v5227_v14  ;;  %v5578_v14 = vld [vmem:[%s6071_s3 + $0x10] sm:$0xff] }
 0x326   : > { %4442 = vmatprep.subr.bf16.mxu0 %v5110_v53 }
 0x328   : > { %4290 = vmatmul.mubr.msk.f32.vlgmr.msra.gmra.mrb[12].mxu0 %vm2209_vm2, %v5317_v23  ;;  %v1167_v23 = vand.u32 2139095040, %v5482_v58 }
 0x329   : > { %4444 = vmatpush3.bf16.msra.mxu0 %v5110_v53  ;;  %4292 = vmatprep.mubr.msk.f32.mxu0 %vm2209_vm2, %v5323_v27  ;;  %v5573_v53 = vld [vmem:[%s6071_s3 + $0x8] sm:$0xff]  ;;  %v1063_v27 = vand.u32 2139095040, %v5484_v1 }
 0x32a   : > { %4446 = vmatprep.subr.bf16.mxu0 %v5112_v50 }
 0x32b   : > { %v1064_v46 = vshrl.u32 %v1063_v27, 23 }
 0x32c   : > { %4293 = vmatmul.mubr.msk.f32.gmra.mrb[14].mxu0 %vm2209_vm2, %v5333_v29  ;;  %v1168_v29 = vshrl.u32 %v1167_v23, 23 }
 0x32d   : > { %4448 = vmatpush3.bf16.msra.mxu0 %v5112_v50  ;;  %4317 = vmatprep.mubr.msk.f32.mxu0 %vm2209_vm2, %v5563_v0  ;;  %v5587_v50 = vld [vmem:[%s6071_s3 + $0x18] sm:$0xff]  ;;  %v3981_v11 = vadd.s32 4294967169, %v1064_v46 }
 0x32e   : > { %v3985_v32 = vadd.s32 4294967169, %v1168_v29 }
 0x32f   : > { %v1070_v10 = vadd.s32 1, %v3981_v11 }
 0x330   : > { %4318 = vmatmul.mubr.msk.f32.vlgmr.msra.gmra.mrb[16].mxu0 %vm2209_vm2, %v5573_v53  ;;  %v1174_v62 = vadd.s32 1, %v3985_v32 }
 0x331   : > { %4320 = vmatprep.mubr.msk.f32.mxu0 %vm2209_vm2, %v5578_v14  ;;  %vm1071_vm12 = vcmp.gt.s32.totalorder %v1070_v10, 0 }
 0x332   : > { %vm1175_vm11 = vcmp.gt.s32.totalorder %v1174_v62, 0  ;;  %v1072_v49 = vsel %vm1071_vm12, %v1070_v10, 0  ;;  %v1172_v10 = vor.u32 8388608, %v1171_v37  ;;  %vm5765_vm12 = vcmp.le.f32.partialorder %v1164_v20, 0.7853982 }
 0x333   : > { %v1176_v39 = vsel %vm1175_vm11, %v1174_v62, 0  ;;  %v1074_v17 = vand.u32 31, %v1072_v49  ;;  %v5614_v47 = vshrl.u32 %v1072_v49, 5  ;;  %vm1062_vm11 = vcmp.lt.s32.totalorder %v5484_v1, 0 }
 0x334   : > { %4321 = vmatmul.mubr.msk.f32.gmra.mrb[18].mxu0 %vm2209_vm2, %v5587_v50  ;;  %v1178_v51 = vand.u32 31, %v1176_v39  ;;  %v5602_v6 = vshrl.u32 %v1176_v39, 5 }
 0x335   : > { %4345 = vmatprep.mubr.msk.f32.mxu0 %vm2209_vm2, %v5451_v33  ;;  %v5598_v33 = vsub.s32 32, %v1074_v17  ;;  %v1086_v30 = vshll.u32 %v6106_v57, %v1074_v17  ;;  %v1089_v34 = vshll.u32 %v6107_v26, %v1074_v17  ;;  %v1077_v31 = vshll.u32 %v6103_v13, %v1074_v17 }
 0x336   : > { %v5596_v4 = vsub.s32 32, %v1178_v51  ;;  %v1190_v28 = vshll.u32 %v6106_v57, %v1178_v51  ;;  %v1193_v35 = vshll.u32 %v6107_v26, %v1178_v51  ;;  %v1181_v19 = vshll.u32 %v6103_v13, %v1178_v51 }
 0x337   : > { %v1184_v25 = vshll.u32 %v6109_v15, %v1178_v51  ;;  %v1187_v21 = vshll.u32 %v6102_v12, %v1178_v51  ;;  %v1087_v36 = vshrl.u32 %v6107_v26, %v5598_v33  ;;  %vm1199_vm13 = vcmp.lt.s32.totalorder %v5602_v6, 4 }
 0x338   : > { %v1191_v63 = vshrl.u32 %v6107_v26, %v5596_v4  ;;  %v1194_v38 = vshrl.u32 %v6108_v43, %v5596_v4  ;;  %v1182_v40 = vshrl.u32 %v6109_v15, %v5596_v4  ;;  %v1185_v5 = vshrl.u32 %v6102_v12, %v5596_v4 }
 0x339   : > { %v1188_v24 = vshrl.u32 %v6106_v57, %v5596_v4  ;;  %v1090_v48 = vshrl.u32 %v6108_v43, %v5598_v33  ;;  %v1080_v45 = vshll.u32 %v6109_v15, %v1074_v17  ;;  %v1078_v22 = vshrl.u32 %v6109_v15, %v5598_v33 }
 0x33a   : > { %v1192_v60 = vor.u32 %v1191_v63, %v1190_v28  ;;  %v1195_v55 = vor.u32 %v1194_v38, %v1193_v35  ;;  %v1081_v23 = vshrl.u32 %v6102_v12, %v5598_v33  ;;  %v1083_v27 = vshll.u32 %v6102_v12, %v1074_v17 }
 0x33b   : > { %v1084_v26 = vshrl.u32 %v6106_v57, %v5598_v33  ;;  %v1183_v29 = vor.u32 %v1182_v40, %v1181_v19  ;;  %v1067_v43 = vand.u32 8388607, %v1060_v9  ;;  %v1088_v46 = vor.u32 %v1087_v36, %v1086_v30 }
 0x33c   : > { %v1186_v32 = vor.u32 %v1185_v5, %v1184_v25  ;;  %v1189_v11 = vor.u32 %v1188_v24, %v1187_v21  ;;  %v1091_v62 = vor.u32 %v1090_v48, %v1089_v34  ;;  %vm1095_vm14 = vcmp.lt.s32.totalorder %v5614_v47, 4 }
 0x33d   : > { %vm1196_vm15 = vcmp.lt.s32.totalorder %v5602_v6, 1  ;;  %vm1198_vm1 = vcmp.lt.s32.totalorder %v5602_v6, 3  ;;  %v1205_v12 = vsel %vm1199_vm13, %v1192_v60, 920167782  ;;  %v1209_v57 = vsel %vm1199_vm13, %v1195_v55, 1326507024 }
 0x33e   : > { %v1079_v15 = vor.u32 %v1078_v22, %v1077_v31  ;;  %v1082_v39 = vor.u32 %v1081_v23, %v1080_v45  ;;  %v1085_v49 = vor.u32 %v1084_v26, %v1083_v27  ;;  %v1068_v51 = vor.u32 8388608, %v1067_v43 }
 0x33f   : > { %vm1092_vm3 = vcmp.lt.s32.totalorder %v5614_v47, 1  ;;  %vm1094_vm4 = vcmp.lt.s32.totalorder %v5614_v47, 3  ;;  %v1101_v17 = vsel %vm1095_vm14, %v1088_v46, 920167782  ;;  %vm1197_vm0 = vcmp.lt.s32.totalorder %v5602_v6, 2 }
 0x340   : > { %v1204_v37 = vsel %vm1196_vm15, %v1183_v29, %v1186_v32  ;;  %v1206_v28 = vsel %vm1198_vm1, %v1189_v11, %v1205_v12  ;;  %v1105_v63 = vsel %vm1095_vm14, %v1091_v62, 1326507024  ;;  %v1208_v35 = vsel %vm1196_vm15, %v1186_v32, %v1189_v11 }
 0x341   : > { %v1210_v38 = vsel %vm1198_vm1, %v1192_v60, %v1209_v57  ;;  %v1212_v19 = vshll.u32 %v1172_v10, 8  ;;  %vm1093_vm5 = vcmp.lt.s32.totalorder %v5614_v47, 2  ;;  %v1100_v25 = vsel %vm1092_vm3, %v1079_v15, %v1082_v39 }
 0x342   : > { %v1102_v21 = vsel %vm1094_vm4, %v1085_v49, %v1101_v17  ;;  %v1207_v40 = vsel %vm1197_vm0, %v1204_v37, %v1206_v28  ;;  %v1104_v5 = vsel %vm1092_vm3, %v1082_v39, %v1085_v49  ;;  %v1106_v30 = vsel %vm1094_vm4, %v1088_v46, %v1105_v63 }
 0x343   : > { %v1211_v36 = vsel %vm1197_vm0, %v1208_v35, %v1210_v38  ;;  %v1108_v24 = vshll.u32 %v1068_v51, 8  ;;  %v1103_v34 = vsel %vm1093_vm5, %v1100_v25, %v1102_v21  ;;  %v1107_v55 = vsel %vm1093_vm5, %v1104_v5, %v1106_v30  ;;  %v5723_v25 = vpop.permute.xlu0 %3168 }
 0x344   : > { %v5677_v48 = vmul.u32.u64.low %v1212_v19, %v1207_v40  ;;  %v5678_v60 = vmul.u32.u64.high %v1212_v19, %v1207_v40, %v5677_v48  ;;  %v1180_v31 = vshrl.u32 %v6103_v13, %v5596_v4  ;;  %v1201_v23 = vsel %vm1199_vm13, %v1189_v11, 2102212464  ;;  %v5725_v40 = vpop.permute.xlu1 %3173 }
 0x345   : > { %v5684_v45 = vmul.u32.u64.low %v1212_v19, %v1211_v36  ;;  %v5685_v22 = vmul.u32.u64.high %v1212_v19, %v1211_v36, %v5684_v45  ;;  %v5689_v27 = vmul.u32.u64.low %v1108_v24, %v1103_v34  ;;  %v5690_v26 = vmul.u32.u64.high %v1108_v24, %v1103_v34, %v5689_v27 }
 0x346   : > { %v1076_v43 = vshrl.u32 %v6103_v13, %v5598_v33  ;;  %v5694_v46 = vmul.u32.u64.low %v1108_v24, %v1107_v55  ;;  %v5695_v62 = vmul.u32.u64.high %v1108_v24, %v1107_v55, %v5694_v46  ;;  %v1097_v10 = vsel %vm1095_vm14, %v1085_v49, 2102212464 }
 0x347   : > { %v1200_v4 = vsel %vm1196_vm15, %v1180_v31, %v1183_v29  ;;  %v1202_v12 = vsel %vm1198_vm1, %v1186_v32, %v1201_v23  ;;  %v1098_v57 = vsel %vm1094_vm4, %v1082_v39, %v1097_v10  ;;  %v1222_v33 = vadd.s32 1, %v5678_v60  ;;  %v5727_v36 = vpop.permute.xlu0 %3178 }
 0x348   : > { %v1096_v11 = vsel %vm1092_vm3, %v1076_v43, %v1079_v15  ;;  %v1203_v13 = vsel %vm1197_vm0, %v1200_v4, %v1202_v12  ;;  %vm1221_vm6 = vc.u32 %v5685_v22, %v5677_v48  ;;  %v1118_v29 = vadd.s32 1, %v5690_v26  ;;  %v5729_v34 = vpop.permute.xlu1 %3183 }
 0x349   : > { %v1099_v49 = vsel %vm1093_vm5, %v1096_v11, %v1098_v57  ;;  %v1219_v51 = vmul.u32 %v1212_v19, %v1203_v13  ;;  %vm1117_vm7 = vc.u32 %v5695_v62, %v5689_v27  ;;  %v1223_v32 = vsel %vm1221_vm6, %v1222_v33, %v5678_v60 }
 0x34a   : > { %v1115_v15 = vmul.u32 %v1108_v24, %v1099_v49  ;;  %v1119_v39 = vsel %vm1117_vm7, %v1118_v29, %v5690_v26  ;;  %v1220_v49 = vadd.s32 %v5677_v48, %v5685_v22  ;;  %vm5775_vm13 = vcmp.le.f32.partialorder %v1060_v9, 0.7853982 }
 0x34b   : > { %v1224_v17 = vadd.s32 %v1223_v32, %v1219_v51  ;;  %v5731_v31 = vpop.permute.xlu0 %3457 }
 0x34c   : > { %v1120_v6 = vadd.s32 %v1119_v39, %v1115_v15  ;;  %v5733_v23 = vpop.permute.xlu1 %3462  ;;  %v1116_v15 = vadd.s32 %v5689_v27, %v5695_v62 }
 0x34d   : > { %v1225_v37 = vadd.s32 536870912, %v1224_v17 }
 0x34e   : > { %v1121_v28 = vadd.s32 536870912, %v1120_v6 }
 0x34f   : > { %v5717_v63 = vshrl.u32 %v1225_v37, 30  ;;  %v5735_v46 = vpop.permute.xlu0 %3467 }
 0x350   : > { %v5719_v35 = vshrl.u32 %v1121_v28, 30  ;;  %v5737_v10 = vpop.permute.xlu1 %3472 }
 0x351   : > { %v1227_v47 = vshll.u32 %v5717_v63, 30 }
 0x352   : > { %v1123_v38 = vshll.u32 %v5719_v35, 30 }
 0x353   : > { %v1228_v19 = vsub.s32 %v1224_v17, %v1227_v47  ;;  %v5739_v11 = vpop.permute.xlu0 %3582 }
 0x354   : > { %v1124_v21 = vsub.s32 %v1120_v6, %v1123_v38  ;;  %6112 = vst [vmem:[#allocation13_spill] sm:$0xff] %v5739_v11  ;;  %v5741_v13 = vpop.permute.xlu1 %3587 }
 0x355   : > { %v1230_v5 = vsub.s32 0, %v1228_v19  ;;  %6113 = vst [vmem:[#allocation14_spill] sm:$0xff] %v5741_v13 }
 0x356   : > { %v1126_v30 = vsub.s32 0, %v1124_v21 }
 0x357   : > { %v3986_v24 = vmin.u32 %v1230_v5, %v1228_v19  ;;  %v5744_v32 = vpop.permute.xlu0 %3592 }
 0x358   : > { %v3982_v60 = vmin.u32 %v1126_v30, %v1124_v21  ;;  %6114 = vst [vmem:[#allocation15_spill] sm:$0xff] %v5744_v32  ;;  %v5747_v6 = vpop.permute.xlu1 %3597 }
 0x359   : > { %v1232_v55 = vclz %v3986_v24  ;;  %6115 = vst [vmem:[#allocation16_spill] sm:$0xff] %v5747_v6 }
 0x35a   : > { %v1128_v45 = vclz %v3982_v60 }
 0x35b   : > { %v3987_v26 = vadd.s32 4294967294, %v1232_v55  ;;  %v5749_v24 = vpop.permute.xlu0 %2444 }
 0x35c   : > { %v3983_v43 = vadd.s32 4294967294, %v1128_v45  ;;  %v5751_v22 = vpop.permute.xlu1 %2449 }
 0x35d   : > { %vm3988_vm8 = vcmp.lt.s32.totalorder %v3987_v26, 0 }
 0x35e   : > { %vm3984_vm9 = vcmp.lt.s32.totalorder %v3983_v43, 0  ;;  %v1235_v4 = vsel %vm3988_vm8, 0, %v3987_v26 }
 0x35f   : > { %v1131_v12 = vsel %vm3984_vm9, 0, %v3983_v43  ;;  %v1240_v57 = vsub.s32 4294967266, %v1235_v4  ;;  %v1236_v29 = vsub.s32 32, %v1235_v4  ;;  %v1237_v37 = vshll.u32 %v1228_v19, %v1235_v4  ;;  %v5753_v62 = vpop.permute.xlu0 %2879 }
 0x360   : > { %v1136_v33 = vsub.s32 4294967266, %v1131_v12  ;;  %v1132_v39 = vsub.s32 32, %v1131_v12  ;;  %v1133_v38 = vshll.u32 %v1124_v21, %v1131_v12  ;;  %v5755_v19 = vpop.permute.xlu1 %2884  ;;  %vm1256_vm9 = vweird.f32 %v5482_v58 }
 0x361   : > { %v1241_v51 = vadd.s32 127, %v1240_v57  ;;  %v1238_v28 = vshrl.u32 %v1220_v49, %v1236_v29 }
 0x362   : > { %v1137_v17 = vadd.s32 127, %v1136_v33  ;;  %v1134_v5 = vshrl.u32 %v1116_v15, %v1132_v39 }
 0x363   : > { %v1242_v47 = vshll.u32 %v1241_v51, 23  ;;  %v1239_v60 = vor.u32 %v1238_v28, %v1237_v37  ;;  %v5757_v12 = vpop.permute.xlu0 %3293 }
 0x364   : > { %v1138_v30 = vshll.u32 %v1137_v17, 23  ;;  %v1135_v55 = vor.u32 %v1134_v5, %v1133_v38  ;;  %6116 = vst [vmem:[#allocation17_spill] sm:$0xff] %v5757_v12  ;;  %v5760_v49 = vpop.permute.xlu1 %3298  ;;  %v1146_v38 = vsub.s32 4, %v5719_v35 }
 0x365   : > { %v1243_v48 = vor.u32 4788187, %v1242_v47  ;;  %v1246_v27 = vcvt.s32.f32 %v1239_v60  ;;  %v1250_v47 = vsub.s32 4, %v5717_v63 }
 0x366   : > { %v1139_v45 = vor.u32 4788187, %v1138_v30  ;;  %v1142_v57 = vcvt.s32.f32 %v1135_v55  ;;  %v1147_v60 = vsel %vm1062_vm11, %v1146_v38, %v5719_v35 }
 0x367   : > { %v1244_v26 = vand.u32 2147483647, %v1243_v48  ;;  %v5771_v39 = vpop.permute.xlu0 %3707  ;;  %v1251_v30 = vsel %vm1166_vm10, %v1250_v47, %v5717_v63 }
 0x368   : > { %v1140_v43 = vand.u32 2147483647, %v1139_v45  ;;  %6119 = vst [vmem:[#allocation18_spill] sm:$0xff] %v5771_v39  ;;  %v5784_v28 = vpop.permute.xlu1 %3712  ;;  %v1253_v55 = vsel %vm5765_vm12, 0, %v1251_v30  ;;  %v1149_v45 = vsel %vm5775_vm13, 0, %v1147_v60 }
 0x369   : > { %v1247_v4 = vmul.f32 %v1246_v27, %v1244_v26  ;;  %6122 = vst [vmem:[#allocation19_spill] sm:$0xff] %v5784_v28  ;;  %v1257_v27 = vadd.s32 3, %v1253_v55 }
 0x36a   : > { %v1143_v21 = vmul.f32 %v1142_v57, %v1140_v43  ;;  %v1153_v43 = vadd.s32 3, %v1149_v45 }
 0x36b   : > { %v1248_v33 = vxor.u32 2147483648, %v1247_v4  ;;  %v5791_v5 = vpop.permute.xlu0 %2454 }
 0x36c   : > { %v1144_v29 = vxor.u32 2147483648, %v1143_v21  ;;  %v5799_v48 = vpop.permute.xlu1 %2889 }
 0x36d   : > { %v1249_v15 = vsel %vm1166_vm10, %v1248_v33, %v1247_v4  ;;  %v1258_v33 = vand.u32 3, %v1257_v27 }
 0x36e   : > { %v1145_v37 = vsel %vm1062_vm11, %v1144_v29, %v1143_v21  ;;  %v1252_v20 = vsel %vm5765_vm12, %v5482_v58, %v1249_v15  ;;  %v1154_v29 = vand.u32 3, %v1153_v43  ;;  %vm1152_vm11 = vweird.f32 %v5484_v1 }
 0x36f   : > { %v1148_v9 = vsel %vm5775_vm13, %v5484_v1, %v1145_v37  ;;  %4613 = vcosq.f32 %v1252_v20  ;;  %v5805_v26 = vpop.permute.xlu0 %3303  ;;  %v2082_v37 = vand.u32 3, %v1253_v55  ;;  %vm1260_vm14 = vcmp.eq.s32.totalorder %v1258_v33, 0 }
 0x370   : > { %4615 = vsinq.f32 %v1252_v20  ;;  %6123 = vst [vmem:[#allocation20_spill] sm:$0xff] %v5805_v26  ;;  %v5807_v63 = vpop.permute.xlu1 %3717  ;;  %vm1263_vm15 = vcmp.eq.s32.totalorder %v1258_v33, 2  ;;  %vm1156_vm1 = vcmp.eq.s32.totalorder %v1154_v29, 0  ;;  %vm1159_vm3 = vcmp.eq.s32.totalorder %v1154_v29, 2 }
 0x371   : > { %4617 = vcosq.f32 %v1148_v9  ;;  %6124 = vst [vmem:[#allocation21_spill] sm:$0xff] %v5807_v63  ;;  %vm1259_vm4 = vcmp.lt.s32.totalorder %v1258_v33, 2  ;;  %vm2084_vm0 = vcmp.eq.s32.totalorder %v2082_v37, 0  ;;  %vm1155_vm5 = vcmp.lt.s32.totalorder %v1154_v29, 2 }
 0x372   : > { %4619 = vsinq.f32 %v1148_v9  ;;  %v1979_v9 = vand.u32 3, %v1149_v45  ;;  %vm2087_vm6 = vcmp.eq.s32.totalorder %v2082_v37, 2  ;;  %vm2083_vm10 = vcmp.lt.s32.totalorder %v2082_v37, 2 }
 0x373   : > { %v2460_v15 = vpop.permute.xlu0 %2459 }
 0x374   : > { %v5809_v47 = vpop.permute.xlu1 %2565  ;;  %vm1981_vm7 = vcmp.eq.s32.totalorder %v1979_v9, 0  ;;  %vm1984_vm8 = vcmp.eq.s32.totalorder %v1979_v9, 2  ;;  %vm1980_vm12 = vcmp.lt.s32.totalorder %v1979_v9, 2 }
 0x377   : > { %v5811_v27 = vpop.permute.xlu0 %2570 }
 0x378   : > { %v5813_v63 = vpop.permute.xlu1 %2894 }
 0x379   : > { %v4614_v57 = vpop.eup %4613 }
 0x37a   : > { %v4616_v4 = vpop.eup %4615  ;;  %v1264_v51 = vxor.u32 2147483648, %v4614_v57 }
 0x37b   : > { %v4618_v21 = vpop.eup %4617  ;;  %v1261_v20 = vxor.u32 2147483648, %v4616_v4 }
 0x37c   : > { %v4620_v35 = vpop.eup %4619  ;;  %v1160_v38 = vxor.u32 2147483648, %v4618_v21  ;;  %v1265_v60 = vsel %vm1263_vm15, %v1264_v51, %v4616_v4  ;;  %v2089_v32 = vsel %vm2087_vm6, %v1264_v51, %v4616_v4 }
 0x37d   : > { %v1157_v17 = vxor.u32 2147483648, %v4620_v35  ;;  %v1262_v30 = vsel %vm1260_vm14, %v4614_v57, %v1261_v20  ;;  %v2086_v28 = vsel %vm2084_vm0, %v4614_v57, %v1261_v20  ;;  %v5832_v20 = vpop.permute.xlu1 %3722 }
 0x37e   : > { %v1161_v55 = vsel %vm1159_vm3, %v1160_v38, %v4620_v35  ;;  %v1266_v39 = vsel %vm1259_vm4, %v1262_v30, %v1265_v60  ;;  %v1986_v13 = vsel %vm1984_vm8, %v1160_v38, %v4620_v35  ;;  %v5823_v30 = vpop.permute.xlu0 %3308  ;;  %v2090_v4 = vsel %vm2083_vm10, %v2086_v28, %v2089_v32 }
 0x37f   : > { %v1158_v43 = vsel %vm1156_vm1, %v4618_v21, %v1157_v17  ;;  %v1983_v11 = vsel %vm1981_vm7, %v4618_v21, %v1157_v17  ;;  %v5820_v26 = vsel %vm1256_vm9, nan, %v1266_v39  ;;  %v5839_v38 = vsel %vm1256_vm9, nan, %v2090_v4 }
 0x380   : > { %v1162_v33 = vsel %vm1155_vm5, %v1158_v43, %v1161_v55  ;;  %v1987_v35 = vsel %vm1980_vm12, %v1983_v11, %v1986_v13 }
 0x381   : > { %v5828_v57 = vsel %vm1152_vm11, nan, %v1162_v33  ;;  %v5852_v43 = vpop.permute.xlu1 %2580 }
 0x3f3   : > { %v4263_v45 = vpop.f32.mrb[8].mxu0 }
 0x3f4   : > { %v2546_v6 = vadd.f32 %v4263_v45, %v5751_v22  ;;  %v2540_v29 = vpop.f32.mrb[9].mxu0 }
 0x3f5   : > { %v2541_v12 = vadd.f32 %v2540_v29, %v5749_v24 }
 0x3f6   : > { %v2560_v60 = vmul.f32 %v2546_v6, %v5820_v26 }
 0x3f7   : > { %v2559_v22 = vmul.f32 %v2541_v12, %v5828_v57  ;;  %v4266_v21 = vpop.f32.mrb[10].mxu0  ;;  %v5843_v12 = vsel %vm1152_vm11, nan, %v1987_v35 }
 0x3f8   : > { %v2584_v39 = vmul.f32 %v5811_v27, %v2560_v60  ;;  %v2556_v51 = vadd.f32 %v4266_v21, %v2460_v15  ;;  %v2550_v24 = vpop.f32.mrb[11].mxu0  ;;  %v5847_v15 = vpop.permute.xlu0 %2575 }
 0x3f9   : > { %v2583_v17 = vmul.f32 %v5809_v47, %v2559_v22  ;;  %v2551_v6 = vadd.f32 %v2550_v24, %v5791_v5 }
 0x3fa   : > { %v2562_v11 = vmul.f32 %v2556_v51, %v5839_v38 }
 0x3fb   : > { %v2587_v32 = vadd.f32 %v2584_v39, %v2583_v17  ;;  %v2561_v13 = vmul.f32 %v2551_v6, %v5843_v12  ;;  %v4291_v28 = vpop.f32.mrb[12].mxu0  ;;  %v6126_v17 = vld [vmem:[#allocation7_spill] sm:$0xff] }
 0x3fc   : > { %v2856_v37 = vadd.f32 %v4291_v28, %v5054_v8  ;;  %v2850_v9 = vpop.f32.mrb[13].mxu0  ;;  %v2586_v55 = vmul.f32 %v5852_v43, %v2562_v11  ;;  %v6125_v8 = vld [vmem:[#allocation6_spill] sm:$0xff] }
 0x3fd   : > { %v2585_v5 = vmul.f32 %v5847_v15, %v2561_v13  ;;  %v2851_v58 = vadd.f32 %v2850_v9, %v5057_v3 }
 0x3fe   : > { %v2870_v1 = vmul.f32 %v2856_v37, %v5501_v52 }
 0x3ff   : > { %v2588_v45 = vadd.f32 %v2587_v32, %v2585_v5  ;;  %v2869_v33 = vmul.f32 %v2851_v58, %v5507_v61  ;;  %v4294_v29 = vpop.f32.mrb[14].mxu0 }
 0x400   : > { %v2866_v60 = vadd.f32 %v4294_v29, %v5063_v42  ;;  %v2860_v22 = vpop.f32.mrb[15].mxu0  ;;  %v6127_v42 = vld [vmem:[#allocation8_spill] sm:$0xff]  ;;  %v6129_v29 = vld [vmem:[#allocation10_spill] sm:$0xff] }
 0x401   : > { %v2589_v4 = vadd.f32 %v2588_v45, %v2586_v55  ;;  %v2861_v21 = vadd.f32 %v2860_v22, %v6125_v8  ;;  %v4433_v35 = vpack.c.bf16 %v2870_v1, %v2869_v33  ;;  %v6128_v1 = vld [vmem:[#allocation9_spill] sm:$0xff] }
 0x402   : > { %v2872_v39 = vmul.f32 %v2866_v60, %v5513_v16 }
 0x403   : > { %v2590_v3 = vrot.slane %v2589_v4, 4  ;;  %v2871_v51 = vmul.f32 %v2861_v21, %v5519_v18  ;;  %4434 = vmatprep.subr.bf16.mxu1 %v4433_v35  ;;  %v4319_v24 = vpop.f32.mrb[16].mxu0 }
 0x404   : > { %v3145_v6 = vadd.f32 %v4319_v24, %v6126_v17  ;;  %4436 = vmatpush3.bf16.msra.mxu1 %v4433_v35  ;;  %v3139_v32 = vpop.f32.mrb[17].mxu0  ;;  %v5876_v35 = vstv %s2160_s19  ;;  %v5891_v17 = vld [vmem:[%s6071_s3 + $0x28] sm:$0xff]  ;;  %s3856_s19 = sshll.u32 %s5899_s13, 4  ;;  %s6020_s19 = int_to_ptr.vmem [resolvable:$true] %s3856_s19 }
 0x405   : > { %v2591_v11 = vadd.f32 %v2590_v3, %v2589_v4  ;;  %v3140_v13 = vadd.f32 %v3139_v32, %v6127_v42  ;;  %v4437_v28 = vpack.c.bf16 %v2872_v39, %v2871_v51  ;;  %v5881_v51 = vld [vmem:[%s6071_s3 + $0x20] sm:$0xff]  ;;  %v5897_v32 = vld [vmem:[%s6071_s3 + $0x30] sm:$0xff]  ;;  %v6131_v42 = vld [vmem:[#allocation12_spill] sm:$0xff]  ;;  %s4623_s7 = scalar_lea.vmem %s6020_s19, 64  ;;  %p4630_p1 = scmp.lt.s32.totalorder %s6020_s19, %s4628_s9 }
 0x406   : > { %v3159_v37 = vmul.f32 %v3145_v6, %v5293_v56  ;;  %v6130_v6 = vld [vmem:[#allocation11_spill] sm:$0xff]  ;;  %p4624_p12 = scmp.ne.s32.totalorder %s6020_s19, %s4623_s7  ;;  %p4631_p2 = scmp.lt.s32.totalorder %s4629_s12, %s4623_s7 }
 0x407   : > { %v2592_v9 = vrot.slane %v2591_v11, 2  ;;  %v3158_v5 = vmul.f32 %v3140_v13, %v5299_v2  ;;  %4438 = vmatprep.subr.bf16.mxu1 %v4437_v28  ;;  %v4322_v58 = vpop.f32.mrb[18].mxu0 }
 0x408   : > { %v3155_v55 = vadd.f32 %v4322_v58, %v6128_v1  ;;  %4440 = vmatpush3.bf16.msra.mxu1 %v4437_v28  ;;  %v3149_v45 = vpop.f32.mrb[19].mxu0  ;;  %p4625_p13 = pnand %p4624_p12, %p4789_p4  ;;  %p4632_p3 = por %p4631_p2, %p4630_p1 }
 0x409   : > { %v2593_v33 = vadd.f32 %v2592_v9, %v2591_v11  ;;  %v3150_v60 = vadd.f32 %v3149_v45, %v6129_v29  ;;  %v4449_v22 = vpack.c.bf16 %v3159_v37, %v3158_v5  ;;  %v5910_v11 = vld [vmem:[%s6071_s3 + $0x38] sm:$0xff] }
 0x40a   : > { %v3161_v4 = vmul.f32 %v3155_v55, %v5305_v44  ;;  %p4626_p0 = pneg %p4625_p13 }
 0x40b   : > { %v2594_v8 = vrot.slane %v2593_v33, 1  ;;  %v3160_v21 = vmul.f32 %v3150_v60, %v5311_v41  ;;  %4304 = vmatmul.mubr.msk.f32.vlgmr.msra.gmra.mrb[12].mxu1 %vm2209_vm2, %v5530_v54  ;;  %4450 = vmatprep.subr.bf16.mxu1 %v4449_v22 }
 0x40c   : > { %4452 = vmatpush3.bf16.msra.mxu1 %v4449_v22  ;;  %4306 = vmatprep.mubr.msk.f32.mxu1 %vm2209_vm2, %v5536_v59  ;;  %p4633_p5 = pnand %p4632_p3, %p4626_p0 }
 0x40d   : > { %v2595_v39 = vadd.f32 %v2594_v8, %v2593_v33  ;;  %v4453_v3 = vpack.c.bf16 %v3161_v4, %v3160_v21 }
 0x40f   : > { %4307 = vmatmul.mubr.msk.f32.gmra.mrb[14].mxu1 %vm2209_vm2, %v5547_v7  ;;  %4454 = vmatprep.subr.bf16.mxu1 %v4453_v3  ;;  %v2597_v24 = vadd.f32 %v5876_v35, %v2595_v39 }
 0x410   : > { %4456 = vmatpush3.bf16.msra.mxu1 %v4453_v3  ;;  %4331 = vmatprep.mubr.msk.f32.mxu1 %vm2209_vm2, %v5881_v51 }
 0x411   : > { %4466 = vmatprep.subr.bf16.mxu1 %v6130_v6  ;;  %2598 = vst [vmem:[%s5899_s13] sm:$0x1] %v2597_v24 }
 0x413   : > { %4332 = vmatmul.mubr.msk.f32.vlgmr.msra.gmra.mrb[16].mxu1 %vm2209_vm2, %v5891_v17 }
 0x414   : > { %4468 = vmatpush3.bf16.msra.mxu1 %v6130_v6  ;;  %4334 = vmatprep.mubr.msk.f32.mxu1 %vm2209_vm2, %v5897_v32 }
 0x415   : > { %4470 = vmatprep.subr.bf16.mxu1 %v6131_v42 }
 0x417   : > { %4335 = vmatmul.mubr.msk.f32.gmra.mrb[18].mxu1 %vm2209_vm2, %v5910_v11 }
 0x418   : > { %4472 = vmatpush3.bf16.msra.mxu1 %v6131_v42  ;;  %4359 = vmatprep.mubr.msk.f32.mxu1 %vm2209_vm2, %v5563_v0 }
 0x41b   : > { %4360 = vmatmul.mubr.msk.f32.vlgmr.msra.gmra.mrb[20].mxu1 %vm2209_vm2, %v5573_v53 }
 0x41c   : > { %4362 = vmatprep.mubr.msk.f32.mxu1 %vm2209_vm2, %v5578_v14 }
 0x41f   : > { %4363 = vmatmul.mubr.msk.f32.gmra.mrb[22].mxu1 %vm2209_vm2, %v5587_v50 }
 0x420   : > { %4390 = vmatprep.mubr.msk.f32.mxu1 %vm2209_vm2, %v5536_v59 }
 0x4de   : > { %v4305_v13 = vpop.f32.mrb[12].mxu1 }
 0x4df   : > { %v2981_v28 = vadd.f32 %v4305_v13, %v5755_v19  ;;  %v2975_v37 = vpop.f32.mrb[13].mxu1 }
 0x4e0   : > { %v2976_v9 = vadd.f32 %v2975_v37, %v5753_v62 }
 0x4e1   : > { %v2995_v0 = vmul.f32 %v2981_v28, %v5820_v26 }
 0x4e2   : > { %v2994_v5 = vmul.f32 %v2976_v9, %v5828_v57  ;;  %v4308_v53 = vpop.f32.mrb[14].mxu1 }
 0x4e3   : > { %v2999_v58 = vmul.f32 %v2995_v0, %v5811_v27  ;;  %v2991_v14 = vadd.f32 %v4308_v53, %v5813_v63  ;;  %v2985_v1 = vpop.f32.mrb[15].mxu1 }
 0x4e4   : > { %v2998_v50 = vmul.f32 %v2994_v5, %v5809_v47  ;;  %v2986_v55 = vadd.f32 %v2985_v1, %v5799_v48 }
 0x4e5   : > { %v2997_v19 = vmul.f32 %v2991_v14, %v5839_v38 }
 0x4e6   : > { %v3002_v45 = vadd.f32 %v2999_v58, %v2998_v50  ;;  %v2996_v33 = vmul.f32 %v2986_v55, %v5843_v12  ;;  %v4333_v62 = vpop.f32.mrb[16].mxu1 }
 0x4e7   : > { %v3270_v29 = vadd.f32 %v4333_v62, %v5725_v40  ;;  %v3264_v60 = vpop.f32.mrb[17].mxu1  ;;  %v3001_v8 = vmul.f32 %v2997_v19, %v5852_v43 }
 0x4e8   : > { %v3000_v22 = vmul.f32 %v2996_v33, %v5847_v15  ;;  %v3265_v4 = vadd.f32 %v3264_v60, %v5723_v25 }
 0x4e9   : > { %v3284_v63 = vmul.f32 %v3270_v29, %v5501_v52 }
 0x4ea   : > { %v3003_v21 = vadd.f32 %v3002_v45, %v3000_v22  ;;  %v3283_v48 = vmul.f32 %v3265_v4, %v5507_v61  ;;  %v4336_v39 = vpop.f32.mrb[18].mxu1 }
 0x4eb   : > { %v3280_v3 = vadd.f32 %v4336_v39, %v5729_v34  ;;  %v3274_v24 = vpop.f32.mrb[19].mxu1 }
 0x4ec   : > { %v3004_v6 = vadd.f32 %v3003_v21, %v3001_v8  ;;  %v3275_v42 = vadd.f32 %v3274_v24, %v5727_v36  ;;  %v4457_v40 = vpack.c.bf16 %v3284_v63, %v3283_v48  ;;  %v6133_v8 = vld [vmem:[#allocation20_spill] sm:$0xff]  ;;  %v6134_v24 = vld [vmem:[#allocation14_spill] sm:$0xff] }
 0x4ed   : > { %v3286_v13 = vmul.f32 %v3280_v3, %v5513_v16 }
 0x4ee   : > { %v3005_v28 = vrot.slane %v3004_v6, 4  ;;  %v3285_v25 = vmul.f32 %v3275_v42, %v5519_v18  ;;  %4458 = vmatprep.subr.bf16.mxu0 %v4457_v40  ;;  %v4361_v37 = vpop.f32.mrb[20].mxu1 }
 0x4ef   : > { %v3559_v9 = vadd.f32 %v4361_v37, %v5733_v23  ;;  %4460 = vmatpush3.bf16.msra.mxu0 %v4457_v40  ;;  %v3553_v0 = vpop.f32.mrb[21].mxu1 }
 0x4f0   : > { %v3006_v5 = vadd.f32 %v3005_v28, %v3004_v6  ;;  %v3554_v53 = vadd.f32 %v3553_v0, %v5731_v31  ;;  %v4461_v34 = vpack.c.bf16 %v3286_v13, %v3285_v25  ;;  %v6135_v13 = vld [vmem:[#allocation13_spill] sm:$0xff] }
 0x4f1   : > { %v3573_v58 = vmul.f32 %v3559_v9, %v5293_v56 }
 0x4f2   : > { %v3007_v14 = vrot.slane %v3006_v5, 2  ;;  %v3572_v36 = vmul.f32 %v3554_v53, %v5299_v2  ;;  %4462 = vmatprep.subr.bf16.mxu0 %v4461_v34  ;;  %v4364_v1 = vpop.f32.mrb[22].mxu1 }
 0x4f3   : > { %v3569_v50 = vadd.f32 %v4364_v1, %v5737_v10  ;;  %4464 = vmatpush3.bf16.msra.mxu0 %v4461_v34  ;;  %v3563_v55 = vpop.f32.mrb[23].mxu1 }
 0x4f4   : > { %v3008_v45 = vadd.f32 %v3007_v14, %v3006_v5  ;;  %v3564_v23 = vadd.f32 %v3563_v55, %v5735_v46  ;;  %v4473_v19 = vpack.c.bf16 %v3573_v58, %v3572_v36  ;;  %v6136_v5 = vld [vmem:[#allocation16_spill] sm:$0xff]  ;;  %v6137_v36 = vld [vmem:[#allocation15_spill] sm:$0xff] }
 0x4f5   : > { %v3575_v33 = vmul.f32 %v3569_v50, %v5305_v44  ;;  %v4622_v44 = vld [vmem:[%s6071_s3 + $0x40] sm:$0xff] }
 0x4f6   : > { %v3009_v31 = vrot.slane %v3008_v45, 1  ;;  %v3574_v62 = vmul.f32 %v3564_v23, %v5311_v41  ;;  %4346 = vmatmul.mubr.msk.f32.vlgmr.msra.gmra.mrb[20].mxu0 %vm2209_vm2, %v5530_v54  ;;  %4474 = vmatprep.subr.bf16.mxu0 %v4473_v19 }
 0x4f7   : > { %4476 = vmatpush3.bf16.msra.mxu0 %v4473_v19  ;;  %4348 = vmatprep.mubr.msk.f32.mxu0 %vm2209_vm2, %v5536_v59 }
 0x4f8   : > { %v3010_v56 = vadd.f32 %v3009_v31, %v3008_v45  ;;  %v4477_v2 = vpack.c.bf16 %v3575_v33, %v3574_v62 }
 0x4fa   : > { %4349 = vmatmul.mubr.msk.f32.gmra.mrb[22].mxu0 %vm2209_vm2, %v5547_v7  ;;  %4478 = vmatprep.subr.bf16.mxu0 %v4477_v2  ;;  %v3011_v46 = vadd.f32 %v3010_v56, %v5876_v35  ;;  %v6138_v56 = vld [vmem:[#allocation19_spill] sm:$0xff] }
 0x4fb   : > { %4480 = vmatpush3.bf16.msra.mxu0 %v4477_v2  ;;  %4373 = vmatprep.mubr.msk.f32.mxu0 %vm2209_vm2, %v5881_v51  ;;  %v6132_v51 = vld [vmem:[#allocation17_spill] sm:$0xff] }
 0x4fc   : > { %3012 = vst [vmem:[%s5899_s13 + $0x1] sm:$0x1] %v3011_v46 }
 0x4fe   : > { %4374 = vmatmul.mubr.msk.f32.vlgmr.msra.gmra.mrb[24].mxu0 %vm2209_vm2, %v5891_v17 }
 0x4ff   : > { %4376 = vmatprep.mubr.msk.f32.mxu0 %vm2209_vm2, %v5897_v32 }
 0x502   : > { %4377 = vmatmul.mubr.msk.f32.gmra.mrb[26].mxu0 %vm2209_vm2, %v5910_v11 }
 0x503   : > { %4387 = vmatprep.mubr.msk.f32.mxu0 %vm2209_vm2, %v4622_v44 }
 0x5c9   : > { %v4347_v41 = vpop.f32.mrb[20].mxu0 }
 0x5ca   : > { %v3395_v59 = vadd.f32 %v4347_v41, %v5760_v49  ;;  %v3389_v10 = vpop.f32.mrb[21].mxu0 }
 0x5cb   : > { %v3390_v29 = vadd.f32 %v3389_v10, %v6132_v51  ;;  %v6140_v51 = vld [vmem:[#allocation21_spill] sm:$0xff] }
 0x5cc   : > { %v3409_v17 = vmul.f32 %v3395_v59, %v5820_v26  ;;  %v6139_v59 = vld [vmem:[#allocation18_spill] sm:$0xff] }
 0x5cd   : > { %v3408_v60 = vmul.f32 %v3390_v29, %v5828_v57  ;;  %v4350_v32 = vpop.f32.mrb[22].mxu0 }
 0x5ce   : > { %v3413_v22 = vmul.f32 %v3409_v17, %v5811_v27  ;;  %v3405_v11 = vadd.f32 %v4350_v32, %v5823_v30  ;;  %v3399_v4 = vpop.f32.mrb[23].mxu0 }
 0x5cf   : > { %v3412_v63 = vmul.f32 %v3408_v60, %v5809_v47  ;;  %v3400_v21 = vadd.f32 %v3399_v4, %v6133_v8 }
 0x5d0   : > { %v3411_v49 = vmul.f32 %v3405_v11, %v5839_v38 }
 0x5d1   : > { %v3416_v48 = vadd.f32 %v3413_v22, %v3412_v63  ;;  %v3410_v39 = vmul.f32 %v3400_v21, %v5843_v12  ;;  %v4375_v3 = vpop.f32.mrb[24].mxu0 }
 0x5d2   : > { %v3684_v6 = vadd.f32 %v4375_v3, %v6134_v24  ;;  %v3678_v42 = vpop.f32.mrb[25].mxu0  ;;  %v3415_v25 = vmul.f32 %v3411_v49, %v5852_v43 }
 0x5d3   : > { %v3414_v40 = vmul.f32 %v3410_v39, %v5847_v15  ;;  %v3679_v28 = vadd.f32 %v3678_v42, %v6135_v13 }
 0x5d4   : > { %v3698_v30 = vmul.f32 %v3684_v6, %v5501_v52 }
 0x5d5   : > { %v3417_v37 = vadd.f32 %v3416_v48, %v3414_v40  ;;  %v3697_v9 = vmul.f32 %v3679_v28, %v5507_v61  ;;  %v4378_v0 = vpop.f32.mrb[26].mxu0 }
 0x5d6   : > { %v3694_v53 = vadd.f32 %v4378_v0, %v6136_v5  ;;  %v3688_v34 = vpop.f32.mrb[27].mxu0 }
 0x5d7   : > { %v3418_v58 = vadd.f32 %v3417_v37, %v3415_v25  ;;  %v4481_v14 = vpack.c.bf16 %v3698_v30, %v3697_v9  ;;  %v3689_v1 = vadd.f32 %v3688_v34, %v6137_v36 }
 0x5d8   : > { %v3700_v50 = vmul.f32 %v3694_v53, %v5513_v16 }
 0x5d9   : > { %v3419_v55 = vrot.slane %v3418_v58, 4  ;;  %v3699_v45 = vmul.f32 %v3689_v1, %v5519_v18  ;;  %4482 = vmatprep.subr.bf16.mxu0 %v4481_v14  ;;  %4489 = vmatprep.subr.bf16.mxu1 %v4481_v14 }
 0x5da   : > { %4484 = vmatpush3.bf16.msra.mxu0 %v4481_v14  ;;  %4491 = vmatpush3.bf16.msra.mxu1 %v4481_v14 }
 0x5db   : > { %v3420_v52 = vadd.f32 %v3419_v55, %v3418_v58  ;;  %v4485_v61 = vpack.c.bf16 %v3700_v50, %v3699_v45 }
 0x5dd   : > { %v3421_v23 = vrot.slane %v3420_v52, 2  ;;  %4486 = vmatprep.subr.bf16.mxu0 %v4485_v61  ;;  %4490 = vmatprep.subr.bf16.mxu1 %v4485_v61 }
 0x5de   : > { %4488 = vmatpush3.bf16.msra.mxu0 %v4485_v61  ;;  %4492 = vmatpush3.bf16.msra.mxu1 %v4485_v61 }
 0x5df   : > { %v3422_v19 = vadd.f32 %v3421_v23, %v3420_v52 }
 0x5e1   : > { %v3423_v33 = vrot.slane %v3422_v19, 1  ;;  %4388 = vmatmul.mubr.msk.f32.vlgmr.msra.gmra.mrb[28].mxu0 %vm2209_vm2, %v5530_v54  ;;  %4391 = vmatmul.mubr.msk.f32.vlgmr.msra.gmra.mrb[24].mxu1 %vm2209_vm2, %v5547_v7 }
 0x5e3   : > { %v3424_v16 = vadd.f32 %v3423_v33, %v3422_v19 }
 0x5e5   : > { %v3425_v18 = vadd.f32 %v3424_v16, %v5876_v35 }
 0x5e7   : > { %3426 = vst [vmem:[%s5899_s13 + $0x2] sm:$0x1] %v3425_v18 }
 0x6b4   : > { %v4389_v31 = vpop.f32.mrb[28].mxu0  ;;  %v4392_v62 = vpop.f32.mrb[24].mxu1 }
 0x6b5   : > { %v3809_v2 = vadd.f32 %v4389_v31, %v6138_v56  ;;  %v3803_v46 = vpop.f32.mrb[29].mxu0  ;;  %v3813_v44 = vpop.f32.mrb[25].mxu1  ;;  %v3819_v41 = vadd.f32 %v4392_v62, %v5832_v20 }
 0x6b6   : > { %v3804_v10 = vadd.f32 %v3803_v46, %v6139_v59  ;;  %v3814_v29 = vadd.f32 %v3813_v44, %v6140_v51 }
 0x6b7   : > { %v3823_v54 = vmul.f32 %v3809_v2, %v5820_v26  ;;  %v3825_v32 = vmul.f32 %v3819_v41, %v5839_v38 }
 0x6b8   : > { %v3822_v7 = vmul.f32 %v3804_v10, %v5828_v57  ;;  %v3824_v17 = vmul.f32 %v3814_v29, %v5843_v12 }
 0x6b9   : > { %v3827_v60 = vmul.f32 %v3823_v54, %v5811_v27  ;;  %v3829_v4 = vmul.f32 %v3825_v32, %v5852_v43 }
 0x6ba   : > { %v3826_v22 = vmul.f32 %v3822_v7, %v5809_v47  ;;  %v3828_v20 = vmul.f32 %v3824_v17, %v5847_v15 }
 0x6bc   : > { %v3830_v11 = vadd.f32 %v3827_v60, %v3826_v22 }
 0x6be   : > { %v3831_v26 = vadd.f32 %v3830_v11, %v3828_v20 }
 0x6c0   : > { %v3832_v63 = vadd.f32 %v3831_v26, %v3829_v4 }
 0x6c2   : > { %v3833_v57 = vrot.slane %v3832_v63, 4 }
 0x6c4   : > { %v3834_v8 = vadd.f32 %v3833_v57, %v3832_v63 }
 0x6c6   : > { %v3835_v21 = vrot.slane %v3834_v8, 2 }
 0x6c8   : > { %v3836_v12 = vadd.f32 %v3835_v21, %v3834_v8 }
 0x6ca   : > { %v3837_v48 = vrot.slane %v3836_v12, 1 }
 0x6cc   : > { %v3838_v27 = vadd.f32 %v3837_v48, %v3836_v12 }
 0x6ce   : > { %v3839_v47 = vadd.f32 %v3838_v27, %v5876_v35 }
 0x6d0   : > { %3840 = vst [vmem:[%s5899_s13 + $0x3] sm:$0x1] %v3839_v47 }
 0x6d1   : > { %4636 = shalt.err (!%p4633_p5)
}
 0x6d2   : > { %s4637_s20 = scalar_lea.hbm %s6018_s29, 64  ;;  %s4641_s15 = scalar_lea.hbm %s6074_s6, 128 }
 0x6d3   : > { %p4638_p6 = scmp.ne.s32.totalorder %s6018_s29, %s4637_s20  ;;  %p4642_p10 = scmp.lt.u32.totalorder %s6018_s29, %s6074_s6 }
 0x6d4   : > { %p4643_p11 = scmp.lt.u32.totalorder %s4641_s15, %s4637_s20  ;;  %p4645_p13 = scmp.lt.u32.totalorder %s4637_s20, %s6018_s29 }
 0x6d5   : > { %p4639_p7 = pnand %p4638_p6, %p4789_p4 }
 0x6d6   : > { %p4644_p12 = por %p4643_p11, %p4642_p10 }
 0x6d7   : > { %p4640_p9 = pneg %p4639_p7 }
 0x6d8   : > { %p4646_p0 = por %p4645_p13, %p4644_p12 }
 0x6da   : > { %p4647_p1 = pnand %p4646_p0, %p4640_p9 }
 0x6dc   : > { %4650 = shalt.err (!%p4647_p1)
}
 0x6dd   : > { %4525 = dma.vmem_to_hbm [thread:$0]  (%p4789_p4), %s6020_s19, 64, %s6018_s29, %s3842_s22  }
 0x6de PF: > { %p4531_p2 = scmp.ge.s32.totalorder %s4701_s28, 2  ;;  %s3868_s18 = sand.u32 1, %s4681_s23  }
 0x6df   : > { %s3869_s21 = scalar_lea.sflag [#allocation4], %s3868_s18 }
 0x6e0   : > { %p4528_p3 = pnand %p4531_p2, %p4796_p8 }
 0x6e2   : > { %4676 = dma.done.wait (!%p4528_p3), %s3869_s21, 64  }
 0x6e3   : > { %4678 = vsyncadd (!%p4528_p3), %s3869_s21, 4294967232  ;;  %s20_s28 = sadd.s32 1, %s4701_s28   ;;  %s6141_s23 = smov %s4685_s24 }
 0x6e4   : > { %p17_p5 = scmp.ge.s32.totalorder %s20_s28, 4   ;;  %s6142_s24 = smov %s4689_s25 }
 0x6e5   : > { %s6143_s25 = smov %s4802_s11  ;;  %s6144_s26 = smov %s4697_s27 }
 0x6e6   : > { %s6145_s27 = smov %s6147_s30  ;;  %19 = sbr.rel (!%p17_p5) target bundleno = 6 (0x6), region = 84 }
 0x6ed   :  { %3874 = vsyncpa [#allocation4], 1 }
 0x6ee   :  { %3876 = vsyncpa [#allocation4 + $0x1], 1 }

</bundles_post_ra>
